<compile_context>
chip_gen: v7x
topology: tpu7x:2x2x1
jax: 0.10.0
libtpu: 0.0.40
codegen_flags: <defaults>
</compile_context>

<pallas_src>
import jax
import jax.numpy as jnp
from jax import lax
from jax.experimental import pallas as pl
from jax.experimental.pallas import tpu as pltpu


def neb_pack_kernel(z_ref, a_ref, blk_ref, out_ref):
    """Scores one lane-pack of P strings.

    z_ref   : (1, N, L) packed positions, L = P*d; string p occupies lanes [p*d, (p+1)*d)
    a_ref   : (L, L)    block-diagonal potential matrix (A repeated on the diagonal)
    blk_ref : (L, L)    block-diagonal matrix of ones (segment sum + in-block broadcast)
    out_ref : (1, 1, L) per-string loss broadcast across each string's d-lane block
    """
    z = z_ref[0]                                    # (N, L)
    Abd = a_ref[...]                                # (L, L)
    blk = blk_ref[...]                              # (L, L)
    N, L = z.shape
    HI = lax.Precision.HIGHEST

    # Potential values & gradient (quadratic potential) for all P strings in one
    # MXU matmul: V_i = 0.5 * z_i^T A z_i ; dV/dz_i = A z_i.
    zA = jnp.dot(z, Abd, preferred_element_type=jnp.float32, precision=HI)   # (N, L)

    row = lax.broadcasted_iota(jnp.int32, (N, L), 0)
    interior = (row > 0) & (row < N - 1)

    # Forward differences dz_i = z[i+1]-z[i] (last row zero); tangent reuses dz.
    z_next = pltpu.roll(z, N - 1, axis=0)            # row i -> z[i+1] (wraps at N-1)
    dz = jnp.where(row < N - 1, z_next - z, 0.0)
    grad = jnp.where(interior, zA, 0.0)              # endpoint rows zeroed
    tangent = jnp.where(interior, dz + pltpu.roll(dz, 1, axis=0), 0.0)

    # Per-(image, string) reductions as MXU segment sums over each d-lane block;
    # the result is already broadcast within the block (blk is block-diag ones).
    t2 = jnp.dot(tangent * tangent, blk, preferred_element_type=jnp.float32,
                 precision=HI)                       # (N, L) ||tangent_i||^2 per string
    gt = jnp.dot(grad * tangent, blk, preferred_element_type=jnp.float32,
                 precision=HI)                       # (N, L) grad_i . tangent_i per string
    # Unnormalized projection: grad - ((g.t)/(t.t)) t == grad - (g.tau) tau.
    # NOTE: if an interior tangent is exactly zero the torch reference NaNs (0/0
    # norm); here the gradient simply passes through unprojected.
    coef = gt * pl.reciprocal(jnp.where(t2 > 0.0, t2, 1.0), approx=True)
    perp = grad - coef * tangent

    # Per-lane contributions of V, spring and |perp|; one more segment-sum matmul
    # gives per-(image, string) totals broadcast over the block, then a single
    # sublane reduce finishes the loss.
    contrib = 0.5 * z * zA + (0.5 * N) * dz * dz + jnp.abs(perp)             # (N, L)
    per_str = jnp.dot(contrib, blk, preferred_element_type=jnp.float32,
                      precision=HI)                  # (N, L)
    loss_row = jnp.sum(per_str, axis=0, keepdims=True) * (1.0 / N)           # (1, L)

    # Lane-dense store: each string's loss replicated across its d-lane block.
    out_ref[...] = loss_row.reshape(1, 1, L)


@jax.jit
def neb_loss_batched(zB, A):
    """zB: (B, N, d) batch of strings, A: (d, d) shared potential -> (B,) losses."""
    B, N, d = zB.shape
    assert d <= 128, "TODO(synk): d > 128 needs multi-tile-per-string packing"
    P = max(1, 128 // d)                 # strings per lane-pack
    G = -(-B // P)                       # number of packs == grid steps
    Bp = G * P
    L = P * d
    if Bp != B:                          # zero-pad to a whole number of packs
        zB = jnp.concatenate([zB, jnp.zeros((Bp - B, N, d), zB.dtype)], axis=0)

    # Layout plumbing on the XLA side (cheap): lane-pack P strings per image row.
    zP = zB.reshape(G, P, N, d).transpose(0, 2, 1, 3).reshape(G, N, L)
    A32 = A.astype(jnp.float32)
    Abd = jnp.kron(jnp.eye(P, dtype=jnp.float32), A32)                     # (L, L)
    blk = jnp.kron(jnp.eye(P, dtype=jnp.float32),
                   jnp.ones((d, d), jnp.float32))                          # (L, L)

    out = pl.pallas_call(
        neb_pack_kernel,
        out_shape=jax.ShapeDtypeStruct((G, 1, L), jnp.float32),
        grid=(G,),
        in_specs=[
            pl.BlockSpec((1, N, L), lambda g: (g, 0, 0)),   # one lane-pack per step
            pl.BlockSpec((L, L), lambda g: (0, 0)),         # shared block-diag A
            pl.BlockSpec((L, L), lambda g: (0, 0)),         # block-diag ones (segments)
        ],
        out_specs=pl.BlockSpec((1, 1, L), lambda g: (g, 0, 0)),  # lane-dense row
        compiler_params=pltpu.CompilerParams(
            dimension_semantics=("parallel",)),             # 2 packs -> both v7x TCs
    )(zP, Abd, blk)

    losses = out[:, 0, :].reshape(G, P, d)[:, :, 0].reshape(Bp)
    return losses[:B]


def neb_loss(z, A):
    """Single-string convenience wrapper (pads the pack with zero strings)."""
    return neb_loss_batched(z[None], A)[0]


def neb_loss_reference(z, A):
    """Pure-JAX transcription of the PyTorch forward scoring (for validation)."""
    N, d = z.shape
    zA = z @ A
    V = 0.5 * jnp.sum(z * zA, axis=1)                       # string.potentials()
    S = N * 0.5 * (z[1:, :] - z[:-1, :]) ** 2
    grad = zA.at[0, :].set(0.0).at[-1, :].set(0.0)          # gradient, endpoints zeroed
    tangent = z[2:, :] - z[: N - 2, :]
    norm = jnp.linalg.norm(tangent, axis=1, keepdims=True)
    tau = jnp.concatenate(
        [jnp.zeros((1, d), z.dtype), tangent / norm, jnp.zeros((1, d), z.dtype)], axis=0)
    dot = jnp.sum(grad * tau, axis=1, keepdims=True)        # diag(grad @ tau^T)
    perp = grad - dot * tau
    return (jnp.sum(V) + jnp.sum(S) + jnp.sum(jnp.abs(perp))) / N


if __name__ == "__main__":
    key = jax.random.PRNGKey(0)
    k_z, k_w = jax.random.split(key)

    B, N, d = 16, 16, 16                 # 2 lane-packs of 8 strings, 16 images in R^16
    zB = jax.random.normal(k_z, (B, N, d), dtype=jnp.float32)
    W = jax.random.normal(k_w, (d, d), dtype=jnp.float32)
    A = (W @ W.T) / d + jnp.eye(d, dtype=jnp.float32)       # symmetric PD potential

    losses = neb_loss_batched(zB, A)
    jax.block_until_ready(losses)

    refs = jax.vmap(neb_loss_reference, in_axes=(0, None))(zB, A)
    assert jnp.allclose(losses, refs, rtol=1e-2, atol=1e-2), (losses, refs)

    # single-string path still works
    l0 = neb_loss(zB[0], A)
    jax.block_until_ready(l0)
    assert jnp.allclose(l0, refs[0], rtol=1e-2, atol=1e-2), (float(l0), float(refs[0]))

    print("KERNEL_OK")
</pallas_src>

<mosaic_0001>
module attributes {stable_mosaic.version = 11 : i64} {
  func.func @neb_pack_kernel(%arg0: i32, %arg1: memref<1x16x128xf32, #tpu.memory_space<vmem>>, %arg2: memref<128x128xf32, #tpu.memory_space<vmem>>, %arg3: memref<128x128xf32, #tpu.memory_space<vmem>>, %arg4: memref<1x1x128xf32, #tpu.memory_space<vmem>>) attributes {dimension_semantics = [#tpu.dimension_semantics<parallel>], iteration_bounds = array<i64: 2>, scalar_prefetch = 0 : i64, scratch_operands = 0 : i64, tpu.core_type = #tpu.core_type<tc>, window_params = [{transform_indices = @transform_0, window_bounds = array<i64: 1, 16, 128>}, {pipeline_mode = #tpu.pipeline_mode<synchronous>, transform_indices = @transform_1, window_bounds = array<i64: 128, 128>}, {pipeline_mode = #tpu.pipeline_mode<synchronous>, transform_indices = @transform_2, window_bounds = array<i64: 128, 128>}, {transform_indices = @transform_3, window_bounds = array<i64: 1, 1, 128>}]} {
    %c0 = arith.constant 0 : index
    %c0_0 = arith.constant 0 : index
    %c0_1 = arith.constant 0 : index
    %0 = vector.load %arg1[%c0, %c0_0, %c0_1] : memref<1x16x128xf32, #tpu.memory_space<vmem>>, vector<1x16x128xf32>
    %1 = vector.shape_cast %0 : vector<1x16x128xf32> to vector<16x128xf32>
    %c0_2 = arith.constant 0 : index
    %c0_3 = arith.constant 0 : index
    %2 = vector.load %arg2[%c0_2, %c0_3] : memref<128x128xf32, #tpu.memory_space<vmem>>, vector<128x128xf32>
    %c0_4 = arith.constant 0 : index
    %c0_5 = arith.constant 0 : index
    %3 = vector.load %arg3[%c0_4, %c0_5] : memref<128x128xf32, #tpu.memory_space<vmem>>, vector<128x128xf32>
    %cst = arith.constant dense<0.000000e+00> : vector<16x128xf32>
    %4 = tpu.matmul %1, %2, %cst {dimension_numbers = #tpu.dot_dimension_numbers<[1], [0], [0], [1], [0, 0, 1, 1], [], []>, precision = #tpu.contract_precision<fp32>} : vector<16x128xf32>, vector<128x128xf32>, vector<16x128xf32> -> vector<16x128xf32>
    %5 = tpu.iota {dimensions = array<i32: 0>} : vector<16x128xi32>
    %c0_i32 = arith.constant 0 : i32
    %6 = vector.broadcast %c0_i32 : i32 to vector<16x128xi32>
    %7 = arith.cmpi sgt, %5, %6 : vector<16x128xi32>
    %c15_i32 = arith.constant 15 : i32
    %8 = vector.broadcast %c15_i32 : i32 to vector<16x128xi32>
    %9 = arith.cmpi slt, %5, %8 : vector<16x128xi32>
    %10 = arith.andi %7, %9 : vector<16x128xi1>
    %c15_i32_6 = arith.constant 15 : i32
    %11 = tpu.dynamic_rotate %1 by %c15_i32_6 dim 0 : vector<16x128xf32>, i32 -> vector<16x128xf32>
    %c15_i32_7 = arith.constant 15 : i32
    %12 = vector.broadcast %c15_i32_7 : i32 to vector<16x128xi32>
    %13 = arith.cmpi slt, %5, %12 : vector<16x128xi32>
    %14 = arith.subf %11, %1 : vector<16x128xf32>
    %cst_8 = arith.constant 0.000000e+00 : f32
    %15 = vector.broadcast %cst_8 : f32 to vector<16x128xf32>
    %16 = arith.select %13, %14, %15 : vector<16x128xi1>, vector<16x128xf32>
    %cst_9 = arith.constant 0.000000e+00 : f32
    %17 = vector.broadcast %cst_9 : f32 to vector<16x128xf32>
    %18 = arith.select %10, %4, %17 : vector<16x128xi1>, vector<16x128xf32>
    %c1_i32 = arith.constant 1 : i32
    %19 = tpu.dynamic_rotate %16 by %c1_i32 dim 0 : vector<16x128xf32>, i32 -> vector<16x128xf32>
    %20 = arith.addf %16, %19 : vector<16x128xf32>
    %cst_10 = arith.constant 0.000000e+00 : f32
    %21 = vector.broadcast %cst_10 : f32 to vector<16x128xf32>
    %22 = arith.select %10, %20, %21 : vector<16x128xi1>, vector<16x128xf32>
    %23 = arith.mulf %22, %22 : vector<16x128xf32>
    %cst_11 = arith.constant dense<0.000000e+00> : vector<16x128xf32>
    %24 = tpu.matmul %23, %3, %cst_11 {dimension_numbers = #tpu.dot_dimension_numbers<[1], [0], [0], [1], [0, 0, 1, 1], [], []>, precision = #tpu.contract_precision<fp32>} : vector<16x128xf32>, vector<128x128xf32>, vector<16x128xf32> -> vector<16x128xf32>
    %25 = arith.mulf %18, %22 : vector<16x128xf32>
    %cst_12 = arith.constant dense<0.000000e+00> : vector<16x128xf32>
    %26 = tpu.matmul %25, %3, %cst_12 {dimension_numbers = #tpu.dot_dimension_numbers<[1], [0], [0], [1], [0, 0, 1, 1], [], []>, precision = #tpu.contract_precision<fp32>} : vector<16x128xf32>, vector<128x128xf32>, vector<16x128xf32> -> vector<16x128xf32>
    %cst_13 = arith.constant 0.000000e+00 : f32
    %27 = vector.broadcast %cst_13 : f32 to vector<16x128xf32>
    %28 = arith.cmpf ogt, %24, %27 : vector<16x128xf32>
    %cst_14 = arith.constant 1.000000e+00 : f32
    %29 = vector.broadcast %cst_14 : f32 to vector<16x128xf32>
    %30 = arith.select %28, %24, %29 : vector<16x128xi1>, vector<16x128xf32>
    %31 = tpu.reciprocal %30 {approx = true} : vector<16x128xf32> -> vector<16x128xf32>
    %32 = arith.mulf %26, %31 : vector<16x128xf32>
    %33 = arith.mulf %32, %22 : vector<16x128xf32>
    %34 = arith.subf %18, %33 : vector<16x128xf32>
    %cst_15 = arith.constant 5.000000e-01 : f32
    %35 = vector.broadcast %cst_15 : f32 to vector<16x128xf32>
    %36 = arith.mulf %35, %1 : vector<16x128xf32>
    %37 = arith.mulf %36, %4 : vector<16x128xf32>
    %cst_16 = arith.constant 8.000000e+00 : f32
    %38 = vector.broadcast %cst_16 : f32 to vector<16x128xf32>
    %39 = arith.mulf %38, %16 : vector<16x128xf32>
    %40 = arith.mulf %39, %16 : vector<16x128xf32>
    %41 = arith.addf %37, %40 : vector<16x128xf32>
    %42 = math.absf %34 : vector<16x128xf32>
    %43 = arith.addf %41, %42 : vector<16x128xf32>
    %cst_17 = arith.constant dense<0.000000e+00> : vector<16x128xf32>
    %44 = tpu.matmul %43, %3, %cst_17 {dimension_numbers = #tpu.dot_dimension_numbers<[1], [0], [0], [1], [0, 0, 1, 1], [], []>, precision = #tpu.contract_precision<fp32>} : vector<16x128xf32>, vector<128x128xf32>, vector<16x128xf32> -> vector<16x128xf32>
    %cst_18 = arith.constant dense<0.000000e+00> : vector<128xf32>
    %45 = vector.multi_reduction <add>, %44, %cst_18 [0] : vector<16x128xf32> to vector<128xf32>
    %46 = vector.shape_cast %45 : vector<128xf32> to vector<1x128xf32>
    %cst_19 = arith.constant 6.250000e-02 : f32
    %47 = vector.broadcast %cst_19 : f32 to vector<1x128xf32>
    %48 = arith.mulf %46, %47 : vector<1x128xf32>
    %49 = vector.shape_cast %48 : vector<1x128xf32> to vector<1x1x128xf32>
    %c0_20 = arith.constant 0 : index
    %c0_21 = arith.constant 0 : index
    %c0_22 = arith.constant 0 : index
    %50 = vector.load %arg4[%c0_20, %c0_21, %c0_22] : memref<1x1x128xf32, #tpu.memory_space<vmem>>, vector<1x1x128xf32>
    tpu.vector_store %arg4[%c0_20, %c0_21, %c0_22], %49 {strides = array<i32>} : memref<1x1x128xf32, #tpu.memory_space<vmem>>, vector<1x1x128xf32>,
    return
  }
  func.func @transform_0(%arg0: i32) -> (i32, i32, i32) {
    %c0_i32 = arith.constant 0 : i32
    %c0_i32_0 = arith.constant 0 : i32
    %c0_i32_1 = arith.constant 0 : i32
    return %arg0, %c0_i32, %c0_i32_0 : i32, i32, i32
  }
  func.func @transform_1(%arg0: i32) -> (i32, i32) {
    %c0_i32 = arith.constant 0 : i32
    %c0_i32_0 = arith.constant 0 : i32
    %c0_i32_1 = arith.constant 0 : i32
    return %c0_i32, %c0_i32_0 : i32, i32
  }
  func.func @transform_2(%arg0: i32) -> (i32, i32) {
    %c0_i32 = arith.constant 0 : i32
    %c0_i32_0 = arith.constant 0 : i32
    %c0_i32_1 = arith.constant 0 : i32
    return %c0_i32, %c0_i32_0 : i32, i32
  }
  func.func @transform_3(%arg0: i32) -> (i32, i32, i32) {
    %c0_i32 = arith.constant 0 : i32
    %c0_i32_0 = arith.constant 0 : i32
    %c0_i32_1 = arith.constant 0 : i32
    return %arg0, %c0_i32, %c0_i32_0 : i32, i32, i32
  }
}

</mosaic_0001>

<bundles_post_ra>
// kernel: mul.21
= control target key start
LH: loop header
LB: loop body
LE: loop exit
PB: predicated region body
PF: predicated region fallthrough
CT: control target
= control target key end

     0   :  { %s364_s0 = inlined_call_operand.vmem [shape: f32[128,128], index: 0, kind: input, shape index: {}]   ;;  %s365_s1 = inlined_call_operand.vmem [shape: f32[128,128], index: 1, kind: input, shape index: {}]   ;;  %s366_s2 = inlined_call_operand.vmem [shape: f32[128,128], index: 2, kind: output, shape index: {}]  }
   0x1   :  { %v3_v0 = vld [vmem:[%s364_s0] sm:$0xff]  ;;  %v160_v2 = vld [vmem:[%s364_s0 + $0x8] sm:$0xff]  ;;  %v163_v5 = vld [vmem:[%s364_s0 + $0x10] sm:$0xff] }
   0x2   :  { %v4_v1 = vld [vmem:[%s365_s1] sm:$0xff]  ;;  %v161_v4 = vld [vmem:[%s365_s1 + $0x8] sm:$0xff]  ;;  %v164_v6 = vld [vmem:[%s365_s1 + $0x10] sm:$0xff] }
   0x3   :  { %v7_v3 = vmul.f32 %v4_v1, %v3_v0  ;;  %v16_v7 = vmul.f32 %v161_v4, %v160_v2  ;;  %v26_v8 = vmul.f32 %v164_v6, %v163_v5  ;;  %v166_v9 = vld [vmem:[%s364_s0 + $0x18] sm:$0xff]  ;;  %v169_v11 = vld [vmem:[%s364_s0 + $0x20] sm:$0xff]  ;;  %v172_v14 = vld [vmem:[%s364_s0 + $0x28] sm:$0xff] }
   0x4   :  { %v167_v10 = vld [vmem:[%s365_s1 + $0x18] sm:$0xff]  ;;  %v170_v13 = vld [vmem:[%s365_s1 + $0x20] sm:$0xff]  ;;  %v173_v15 = vld [vmem:[%s365_s1 + $0x28] sm:$0xff] }
   0x5   :  { %9 = vst [vmem:[%s366_s2] sm:$0xff] %v7_v3  ;;  %v36_v12 = vmul.f32 %v167_v10, %v166_v9  ;;  %162 = vst [vmem:[%s366_s2 + $0x8] sm:$0xff] %v16_v7  ;;  %v46_v16 = vmul.f32 %v170_v13, %v169_v11  ;;  %v56_v17 = vmul.f32 %v173_v15, %v172_v14  ;;  %v175_v18 = vld [vmem:[%s364_s0 + $0x30] sm:$0xff]  ;;  %v178_v20 = vld [vmem:[%s364_s0 + $0x38] sm:$0xff] }
   0x6   :  { %165 = vst [vmem:[%s366_s2 + $0x10] sm:$0xff] %v26_v8  ;;  %v176_v19 = vld [vmem:[%s365_s1 + $0x30] sm:$0xff]  ;;  %v179_v22 = vld [vmem:[%s365_s1 + $0x38] sm:$0xff]  ;;  %v181_v23 = vld [vmem:[%s364_s0 + $0x40] sm:$0xff] }
   0x7   :  { %168 = vst [vmem:[%s366_s2 + $0x18] sm:$0xff] %v36_v12  ;;  %v66_v21 = vmul.f32 %v176_v19, %v175_v18  ;;  %v182_v24 = vld [vmem:[%s365_s1 + $0x40] sm:$0xff]  ;;  %171 = vst [vmem:[%s366_s2 + $0x20] sm:$0xff] %v46_v16  ;;  %v76_v25 = vmul.f32 %v179_v22, %v178_v20  ;;  %v184_v27 = vld [vmem:[%s364_s0 + $0x48] sm:$0xff] }
   0x8   :  { %174 = vst [vmem:[%s366_s2 + $0x28] sm:$0xff] %v56_v17  ;;  %v86_v26 = vmul.f32 %v182_v24, %v181_v23  ;;  %v185_v28 = vld [vmem:[%s365_s1 + $0x48] sm:$0xff]  ;;  %v187_v29 = vld [vmem:[%s364_s0 + $0x50] sm:$0xff]  ;;  %v190_v32 = vld [vmem:[%s364_s0 + $0x58] sm:$0xff] }
   0x9   :  { %177 = vst [vmem:[%s366_s2 + $0x30] sm:$0xff] %v66_v21  ;;  %v96_v30 = vmul.f32 %v185_v28, %v184_v27  ;;  %v188_v31 = vld [vmem:[%s365_s1 + $0x50] sm:$0xff]  ;;  %v191_v33 = vld [vmem:[%s365_s1 + $0x58] sm:$0xff]  ;;  %180 = vst [vmem:[%s366_s2 + $0x38] sm:$0xff] %v76_v25 }
   0xa   :  { %183 = vst [vmem:[%s366_s2 + $0x40] sm:$0xff] %v86_v26  ;;  %v106_v34 = vmul.f32 %v188_v31, %v187_v29  ;;  %v116_v35 = vmul.f32 %v191_v33, %v190_v32  ;;  %v193_v36 = vld [vmem:[%s364_s0 + $0x60] sm:$0xff]  ;;  %v196_v38 = vld [vmem:[%s364_s0 + $0x68] sm:$0xff]  ;;  %v199_v41 = vld [vmem:[%s364_s0 + $0x70] sm:$0xff] }
   0xb   :  { %v194_v37 = vld [vmem:[%s365_s1 + $0x60] sm:$0xff]  ;;  %186 = vst [vmem:[%s366_s2 + $0x48] sm:$0xff] %v96_v30  ;;  %v197_v40 = vld [vmem:[%s365_s1 + $0x68] sm:$0xff]  ;;  %v200_v42 = vld [vmem:[%s365_s1 + $0x70] sm:$0xff] }
   0xc   :  { %v126_v39 = vmul.f32 %v194_v37, %v193_v36  ;;  %189 = vst [vmem:[%s366_s2 + $0x50] sm:$0xff] %v106_v34  ;;  %192 = vst [vmem:[%s366_s2 + $0x58] sm:$0xff] %v116_v35  ;;  %v136_v43 = vmul.f32 %v197_v40, %v196_v38  ;;  %v146_v44 = vmul.f32 %v200_v42, %v199_v41  ;;  %v202_v45 = vld [vmem:[%s364_s0 + $0x78] sm:$0xff] }
   0xd   :  { %v203_v46 = vld [vmem:[%s365_s1 + $0x78] sm:$0xff] }
   0xe   :  { %195 = vst [vmem:[%s366_s2 + $0x60] sm:$0xff] %v126_v39  ;;  %v156_v47 = vmul.f32 %v203_v46, %v202_v45  ;;  %198 = vst [vmem:[%s366_s2 + $0x68] sm:$0xff] %v136_v43 }
   0xf   :  { %201 = vst [vmem:[%s366_s2 + $0x70] sm:$0xff] %v146_v44 }
  0x10   :  { %204 = vst [vmem:[%s366_s2 + $0x78] sm:$0xff] %v156_v47 }

// kernel: squeeze.2
= control target key start
LH: loop header
LB: loop body
LE: loop exit
PB: predicated region body
PF: predicated region fallthrough
CT: control target
= control target key end

     0   :  { %s66_s8 = smov 80   ;;  %vm7_vm0 = vcmask 130048   ;;  %s67_s11 = smov 96   ;;  %s117_s0 = inlined_call_operand.vmem [shape: f32[2,128], index: 0, kind: input, shape index: {}]   ;;  %s118_s1 = inlined_call_operand.vmem [shape: f32[2,8,16], index: 1, kind: output, shape index: {}]  }
   0x1   :  { %v4_v0 = vld [vmem:[%s117_s0] sm:$0x3]  ;;  %s65_s0 = smov 112   ;;  %s68_s12 = smov 64  }
   0x2   :  { %5 = vst [vmem:[#allocation0] sm:$0x3] %v4_v0  ;;  %s69_s13 = smov 48   ;;  %s70_s14 = smov 32  }
   0x3   :  { %s71_s15 = smov 16  }
   0x9   :  { %v9_v1 = vld [vmem:[#allocation0] sm:$0x3]  }
   0xa   :  { %v21_v2 = vld [vmem:[#allocation0] sm:$0x3]   ;;  %10 = vrot.lane.b32.xlu0 %v9_v1, %s65_s0 }
   0xb   :  { %22 = vrot.lane.b32.xlu1 %v21_v2, %s66_s8  ;;  %v15_v3 = vld [vmem:[#allocation0] sm:$0x3]  }
   0xc   :  { %v27_v4 = vld [vmem:[#allocation0] sm:$0x3]  }
   0xd   :  { %v6_v5 = vld [vmem:[#allocation0] sm:$0x3]  }
   0xe   :  { %8 = vst.msk [vmem:[%s118_s1] ss:$8 sm:$0x3] %vm7_vm0, %v6_v5   ;;  %16 = vrot.lane.b32.xlu0 %v15_v3, %s67_s11  ;;  %v33_v6 = vld [vmem:[#allocation0] sm:$0x3]  }
   0xf   :  { %28 = vrot.lane.b32.xlu1 %v27_v4, %s68_s12  ;;  %v39_v7 = vld [vmem:[#allocation0] sm:$0x3]  }
  0x10   :  { %v45_v8 = vld [vmem:[#allocation0] sm:$0x3]  }
  0x12   :  { %34 = vrot.lane.b32.xlu0 %v33_v6, %s69_s13 }
  0x13   :  { %40 = vrot.lane.b32.xlu1 %v39_v7, %s70_s14 }
  0x16   :  { %46 = vrot.lane.b32.xlu0 %v45_v8, %s71_s15 }
  0x7c   :  { %v11_v9 = vpop.permute.xlu0 %10  }
  0x7d   :  { %v23_v10 = vpop.permute.xlu1 %22   ;;  %51 = vst.msk [vmem:[%s118_s1 + $0x1] ss:$8 sm:$0x3] %vm7_vm0, %v11_v9  }
  0x7e   :  { %53 = vst.msk [vmem:[%s118_s1 + $0x3] ss:$8 sm:$0x3] %vm7_vm0, %v23_v10  }
  0x80   :  { %v17_v11 = vpop.permute.xlu0 %16  }
  0x81   :  { %v29_v12 = vpop.permute.xlu1 %28   ;;  %52 = vst.msk [vmem:[%s118_s1 + $0x2] ss:$8 sm:$0x3] %vm7_vm0, %v17_v11  }
  0x82   :  { %54 = vst.msk [vmem:[%s118_s1 + $0x4] ss:$8 sm:$0x3] %vm7_vm0, %v29_v12  }
  0x84   :  { %v35_v13 = vpop.permute.xlu0 %34  }
  0x85   :  { %v41_v14 = vpop.permute.xlu1 %40   ;;  %55 = vst.msk [vmem:[%s118_s1 + $0x5] ss:$8 sm:$0x3] %vm7_vm0, %v35_v13  }
  0x86   :  { %56 = vst.msk [vmem:[%s118_s1 + $0x6] ss:$8 sm:$0x3] %vm7_vm0, %v41_v14  }
  0x88   :  { %v47_v15 = vpop.permute.xlu0 %46  }
  0x89   :  { %57 = vst.msk [vmem:[%s118_s1 + $0x7] ss:$8 sm:$0x3] %vm7_vm0, %v47_v15  }

// kernel: squeeze.3
= control target key start
LH: loop header
LB: loop body
LE: loop exit
PB: predicated region body
PF: predicated region fallthrough
CT: control target
= control target key end

     0   :  { %s85_s0 = inlined_call_operand.vmem [shape: f32[2,8], index: 0, kind: input, shape index: {}]   ;;  %s86_s1 = inlined_call_operand.hbm [shape: f32[16], index: 1, kind: output, shape index: {}]  }
   0x1   :  { %v5_v0 = vld [vmem:[%s85_s0] sm:$0x3] }
   0x2   :  { %6 = vst [vmem:[#allocation3] sm:$0x3] %v5_v0 }
   0x3   :  { %2 = vsyncpa [#allocation1], 0  ;;  %vm8_vm0 = vcmask 64512   ;;  %s58_s0 = smov 8   ;;  %vm14_vm1 = vcmask 130112   ;;  %s59_s8 = smov [#allocation0]  }
   0x4   :  { %s26_s9 = sshll.u32 %s59_s8, 4  ;;  %s27_s9 = int_to_ptr.vmem [resolvable:$true] %s26_s9 }
   0x5   :  { %s34_s10 = scalar_lea.vmem %s27_s9, 16  ;;  %s38_s11 = scalar_lea.vmem %s27_s9, 32 }
   0x6   :  { %p35_p0 = scmp.ne.s32.totalorder %s27_s9, %s34_s10  ;;  %p39_p1 = scmp.lt.s32.totalorder %s27_s9, %s27_s9 }
   0x7   :  { %p40_p2 = scmp.lt.s32.totalorder %s38_s11, %s34_s10 }
   0x9   :  { %v11_v1 = vld [vmem:[#allocation3 + $0x1] sm:$0x1]   ;;  %v7_v2 = vld [vmem:[#allocation3] sm:$0x1]   ;;  %p41_p3 = por %p40_p2, %p39_p1 }
   0xa   :  { %12 = vrot.lane.b32.xlu0 %v11_v1, %s58_s0  ;;  %9 = vst.msk [vmem:[#allocation2] sm:$0x1] %vm8_vm0, %v7_v2  }
   0xb   :  { %p42_p4 = pnand %p41_p3, %p35_p0 }
  0x7c   :  { %v13_v3 = vpop.permute.xlu0 %12  }
  0x7d   :  { %15 = vst.msk [vmem:[#allocation2] sm:$0x1] %vm14_vm1, %v13_v3  }
  0x84   :  { %v19_v4 = vld [vmem:[#allocation2] sm:$0x1] }
  0x85   :  { %21 = vst [vmem:[#allocation0] sm:$0x1] %v19_v4 }
  0x86   :  { %45 = shalt.err (!%p42_p4)
}
  0x87   :  { %s46_s14 = scalar_lea.hbm %s86_s1, 16 }
  0x88   :  { %p47_p5 = scmp.ne.s32.totalorder %s86_s1, %s46_s14  ;;  %p50_p6 = scmp.lt.u32.totalorder %s46_s14, %s86_s1 }
  0x8a   :  { %p52_p7 = pnand %p50_p6, %p47_p5 }
  0x8c   :  { %55 = shalt.err (!%p52_p7)
}
  0x8d   :  { %29 = dma.vmem_to_hbm [thread:$0]  %s27_s9, 16, %s86_s1, [#allocation1]  }
  0x8e   :  { %56 = dma.done.wait [#allocation1], 16  }
  0x8f   :  { %57 = vsyncadd [#allocation1], 4294967280 }
  0x90   :  { %31 = vsyncpa [#allocation1], 1 }

// kernel: neb_loss_batched.1
= control target key start
LH: loop header
LB: loop body
LE: loop exit
PB: predicated region body
PF: predicated region fallthrough
CT: control target
= control target key end

     0   :  { %s5184_s12 = smov 0   ;;  %s6178_s0 = inlined_call_operand.vmem [shape: f32[2,16,128], index: 0, kind: input, shape index: {}]   ;;  %s6179_s1 = inlined_call_operand.vmem [shape: f32[128,128], index: 1, kind: input, shape index: {}]   ;;  %s6180_s2 = inlined_call_operand.vmem [shape: f32[128,128], index: 2, kind: input, shape index: {}]   ;;  %s6181_s3 = inlined_call_operand.vmem [shape: f32[2,1,128], index: 3, kind: output, shape index: {}]  }
   0x1 LB: > { %s3052_s13 = sadd.s32 4294967295, %s5162_s12   ;;  %p3056_p0 = scmp.ge.s32.totalorder %s5162_s12, 1  ;;  %s5162_s12 = sphi %s5184_s12, %s13_s12  }
   0x2   : > { %p137_p1 = scmp.lt.s32.totalorder %s5162_s12, 3 }
   0x4   : > { %p138_p2 = pnand %p3056_p0, %p137_p1 }
   0x6   : > { %141 = sbr.rel (%p138_p2) target bundleno = 1221 (0x4c5), region = 32 }
   0xd   : > { %v169_v0 = vld [vmem:[%s6179_s1] sm:$0xff]  ;;  %v170_v1 = vld [vmem:[%s6179_s1 + $0x8] sm:$0xff]  ;;  %v171_v2 = vld [vmem:[%s6179_s1 + $0x10] sm:$0xff]  ;;  %p5201_p3 = scmp.lt.s32.totalorder %s3052_s13, 1 }
   0xe   : > { %v202_v3 = vand.u32 4294901760, %v169_v0  ;;  %v205_v4 = vand.u32 4294901760, %v170_v1  ;;  %v172_v5 = vld [vmem:[%s6179_s1 + $0x18] sm:$0xff]  ;;  %v208_v6 = vand.u32 4294901760, %v171_v2  ;;  %v5211_v7 = vld [vmem:[%s6179_s1 + $0x20] sm:$0xff]  ;;  %v5216_v8 = vld [vmem:[%s6179_s1 + $0x28] sm:$0xff] }
   0xf   : > { %v211_v9 = vand.u32 4294901760, %v172_v5  ;;  %v214_v11 = vand.u32 4294901760, %v5211_v7  ;;  %v217_v12 = vand.u32 4294901760, %v5216_v8  ;;  %v5227_v14 = vld [vmem:[%s6179_s1 + $0x30] sm:$0xff]  ;;  %v5232_v15 = vld [vmem:[%s6179_s1 + $0x38] sm:$0xff]  ;;  %s6273_s13 = smov (!%p5201_p3, %s3052_s13), 1 }
  0x10   : > { %v5218_v10 = vpack.c.bf16 %v205_v4, %v202_v3  ;;  %s3061_s4 = sshll.u32 %s6273_s13, 4  ;;  %v220_v17 = vand.u32 4294901760, %v5227_v14  ;;  %v223_v18 = vand.u32 4294901760, %v5232_v15  ;;  %v177_v19 = vld [vmem:[%s6179_s1 + $0x40] sm:$0xff]  ;;  %v178_v20 = vld [vmem:[%s6179_s1 + $0x48] sm:$0xff]  ;;  %v179_v26 = vld [vmem:[%s6179_s1 + $0x50] sm:$0xff]  ;;  %v5277_v29 = vsub.f32 %v169_v0, %v202_v3  ;;  %s166_s8 = scalar_lea.vmem %s6181_s3, %s6273_s13 }
  0x11   : > { %v5222_v13 = vpack.c.bf16 %v211_v9, %v208_v6  ;;  %v5242_v16 = vpack.c.bf16 %v217_v12, %v214_v11  ;;  %s5255_s11 = scalar_lea.vmem %s6178_s0, %s3061_s4  ;;  %v226_v23 = vand.u32 4294901760, %v177_v19  ;;  %v229_v24 = vand.u32 4294901760, %v178_v20  ;;  %v180_v27 = vld [vmem:[%s6179_s1 + $0x58] sm:$0xff]  ;;  %v181_v36 = vld [vmem:[%s6179_s1 + $0x60] sm:$0xff]  ;;  %v182_v37 = vld [vmem:[%s6179_s1 + $0x68] sm:$0xff] }
  0x12   : > { %4335 = vmatprep.subr.bf16.mxu0 %v5218_v10  ;;  %v5258_v21 = vld [vmem:[%s5255_s11] sm:$0xff]  ;;  %v5265_v25 = vpack.c.bf16 %v223_v18, %v220_v17  ;;  %v5279_v30 = vsub.f32 %v170_v1, %v205_v4  ;;  %v5282_v31 = vld [vmem:[%s5255_s11 + $0x8] sm:$0xff]  ;;  %v232_v34 = vand.u32 4294901760, %v179_v26  ;;  %v235_v35 = vand.u32 4294901760, %v180_v27  ;;  %v183_v38 = vld [vmem:[%s6179_s1 + $0x70] sm:$0xff] }
  0x13   : > { %4337 = vmatpush3.bf16.msra.mxu0 %v5218_v10  ;;  %v5261_v22 = vand.u32 4294901760, %v5258_v21  ;;  %v5286_v33 = vpack.c.bf16 %v229_v24, %v226_v23  ;;  %v184_v39 = vld [vmem:[%s6179_s1 + $0x78] sm:$0xff]  ;;  %v305_v41 = vand.u32 4294901760, %v5277_v29  ;;  %v5305_v42 = vsub.f32 %v171_v2, %v208_v6 }
  0x14   : > { %4339 = vmatprep.subr.bf16.mxu0 %v5222_v13  ;;  %v5307_v43 = vsub.f32 %v172_v5, %v211_v9  ;;  %v312_v44 = vand.u32 4294901760, %v5279_v30  ;;  %v5311_v45 = vand.u32 4294901760, %v5282_v31  ;;  %v238_v47 = vand.u32 4294901760, %v181_v36 }
  0x15   : > { %v5275_v28 = vsub.f32 %v5258_v21, %v5261_v22  ;;  %v241_v48 = vand.u32 4294901760, %v182_v37  ;;  %v244_v49 = vand.u32 4294901760, %v183_v38  ;;  %v247_v50 = vand.u32 4294901760, %v184_v39 }
  0x16   : > { %6220 = vst [vmem:[#allocation2_spill] sm:$0xff] %v5311_v45  ;;  %v5315_v51 = vpack.c.bf16 %v235_v35, %v232_v34  ;;  %v306_v52 = vsub.f32 %v5277_v29, %v305_v41  ;;  %v319_v53 = vand.u32 4294901760, %v5305_v42  ;;  %v326_v54 = vand.u32 4294901760, %v5307_v43 }
  0x17   : > { %4341 = vmatpush3.bf16.msra.mxu0 %v5222_v13  ;;  %v6183_v32 = vand.u32 4294901760, %v5275_v28  ;;  %v313_v55 = vsub.f32 %v5279_v30, %v312_v44  ;;  %v5323_v56 = vsub.f32 %v5282_v31, %v5311_v45  ;;  %v5326_v57 = vsub.f32 %v5211_v7, %v214_v11 }
  0x18   : > { %4343 = vmatprep.subr.bf16.mxu0 %v5242_v16  ;;  %v5329_v58 = vsub.f32 %v5216_v8, %v217_v12  ;;  %v5332_v59 = vpack.c.bf16 %v241_v48, %v238_v47  ;;  %v5335_v60 = vpack.c.bf16 %v247_v50, %v244_v49  ;;  %v307_v61 = vand.u32 4294901760, %v306_v52 }
  0x19   : > { %v285_v40 = vsub.f32 %v5275_v28, %v6183_v32  ;;  %v320_v62 = vsub.f32 %v5305_v42, %v319_v53  ;;  %v327_v63 = vsub.f32 %v5307_v43, %v326_v54  ;;  %v314_v0 = vand.u32 4294901760, %v313_v55 }
  0x1a   : > { %v6182_v1 = vand.u32 4294901760, %v5323_v56  ;;  %v333_v2 = vand.u32 4294901760, %v5326_v57  ;;  %v5342_v3 = vsub.f32 %v5227_v14, %v220_v17  ;;  %v340_v4 = vand.u32 4294901760, %v5329_v58 }
  0x1b   : > { %4345 = vmatpush3.bf16.msra.mxu0 %v5242_v16  ;;  %v286_v46 = vand.u32 4294901760, %v285_v40  ;;  %v5346_v5 = vsub.f32 %v5232_v15, %v223_v18  ;;  %v5348_v6 = vsub.f32 %v177_v19, %v226_v23  ;;  %v5350_v7 = vsub.f32 %v178_v20, %v229_v24 }
  0x1c   : > { %4347 = vmatprep.subr.bf16.mxu0 %v5265_v25  ;;  %v5353_v8 = vsub.f32 %v179_v26, %v232_v34  ;;  %v5355_v9 = vsub.f32 %v180_v27, %v235_v35  ;;  %v5357_v11 = vsub.f32 %v181_v36, %v238_v47  ;;  %v5359_v12 = vsub.f32 %v182_v37, %v241_v48 }
  0x1d   : > { %3526 = vmatprep.mubr.f32.mxu0 %v286_v46  ;;  %v321_v14 = vand.u32 4294901760, %v320_v62  ;;  %v328_v17 = vand.u32 4294901760, %v327_v63  ;;  %v5362_v15 = vsub.f32 %v183_v38, %v244_v49  ;;  %v5364_v18 = vsub.f32 %v184_v39, %v247_v50 }
  0x1e   : > { %v4366_v19 = vpack.c.bf16 %v314_v0, %v307_v61  ;;  %v295_v20 = vsub.f32 %v5323_v56, %v6182_v1  ;;  %v334_v23 = vsub.f32 %v5326_v57, %v333_v2  ;;  %v347_v24 = vand.u32 4294901760, %v5342_v3 }
  0x1f   : > { %4349 = vmatpush3.bf16.msra.mxu0 %v5265_v25  ;;  %v341_v26 = vsub.f32 %v5329_v58, %v340_v4  ;;  %v354_v27 = vand.u32 4294901760, %v5346_v5  ;;  %v361_v34 = vand.u32 4294901760, %v5348_v6  ;;  %v368_v35 = vand.u32 4294901760, %v5350_v7 }
  0x20   : > { %4351 = vmatprep.subr.bf16.mxu0 %v5286_v33  ;;  %v375_v36 = vand.u32 4294901760, %v5353_v8  ;;  %v382_v37 = vand.u32 4294901760, %v5355_v9  ;;  %v389_v38 = vand.u32 4294901760, %v5357_v11  ;;  %v396_v39 = vand.u32 4294901760, %v5359_v12 }
  0x21   : > { %v403_v40 = vand.u32 4294901760, %v5362_v15  ;;  %v410_v46 = vand.u32 4294901760, %v5364_v18  ;;  %v5383_v47 = vpack.c.bf16 %v312_v44, %v305_v41  ;;  %v5385_v48 = vpack.c.bf16 %v326_v54, %v319_v53 }
  0x22   : > { %v5387_v49 = vpack.c.bf16 %v340_v4, %v333_v2  ;;  %v5389_v50 = vpack.c.bf16 %v354_v27, %v347_v24  ;;  %v5391_v52 = vpack.c.bf16 %v368_v35, %v361_v34  ;;  %v296_v55 = vand.u32 4294901760, %v295_v20 }
  0x23   : > { %4353 = vmatpush3.bf16.msra.mxu0 %v5286_v33  ;;  %v5393_v61 = vpack.c.bf16 %v382_v37, %v375_v36  ;;  %v5395_v62 = vpack.c.bf16 %v396_v39, %v389_v38  ;;  %v5397_v63 = vpack.c.bf16 %v410_v46, %v403_v40  ;;  %v348_v41 = vsub.f32 %v5342_v3, %v347_v24 }
  0x24   : > { %4355 = vmatprep.subr.bf16.mxu0 %v5315_v51  ;;  %v4370_v44 = vpack.c.bf16 %v328_v17, %v321_v14  ;;  %v335_v53 = vand.u32 4294901760, %v334_v23  ;;  %v342_v54 = vand.u32 4294901760, %v341_v26  ;;  %v355_v0 = vsub.f32 %v5346_v5, %v354_v27 }
  0x25   : > { %6221 = vst [vmem:[#allocation3_spill] sm:$0xff] %v5393_v61  ;;  %6222 = vst [vmem:[#allocation4_spill] sm:$0xff] %v5395_v62  ;;  %v349_v2 = vand.u32 4294901760, %v348_v41  ;;  %v362_v1 = vsub.f32 %v5348_v6, %v361_v34  ;;  %v369_v32 = vsub.f32 %v5350_v7, %v368_v35  ;;  %v376_v24 = vsub.f32 %v5353_v8, %v375_v36 }
  0x26   : > { %6223 = vst [vmem:[#allocation5_spill] sm:$0xff] %v5397_v63  ;;  %v4374_v4 = vpack.c.bf16 %v342_v54, %v335_v53  ;;  %v356_v20 = vand.u32 4294901760, %v355_v0  ;;  %v383_v14 = vsub.f32 %v5355_v9, %v382_v37  ;;  %v390_v41 = vsub.f32 %v5357_v11, %v389_v38 }
  0x27   : > { %4357 = vmatpush3.bf16.msra.mxu0 %v5315_v51  ;;  %v363_v23 = vand.u32 4294901760, %v362_v1  ;;  %v370_v26 = vand.u32 4294901760, %v369_v32  ;;  %v397_v34 = vsub.f32 %v5359_v12, %v396_v39  ;;  %v404_v37 = vsub.f32 %v5362_v15, %v403_v40 }
  0x28   : > { %4359 = vmatprep.subr.bf16.mxu0 %v5332_v59  ;;  %v4378_v17 = vpack.c.bf16 %v356_v20, %v349_v2  ;;  %v384_v27 = vand.u32 4294901760, %v383_v14  ;;  %v411_v53 = vsub.f32 %v5364_v18, %v410_v46  ;;  %v885_v0 = vlaneseq  ;;  %v185_v14 = vld [vmem:[%s6180_s2] sm:$0xff] }
  0x29   : > { %v398_v36 = vand.u32 4294901760, %v397_v34  ;;  %v405_v1 = vand.u32 4294901760, %v404_v37  ;;  %v4398_v39 = vpack.c.bf16 %v5279_v30, %v5277_v29  ;;  %v894_v40 = vrot.slane %v5258_v21, 1  ;;  %v186_v29 = vld [vmem:[%s6180_s2 + $0x8] sm:$0xff]  ;;  %v5430_v30 = vld [vmem:[%s6180_s2 + $0x10] sm:$0xff] }
  0x2a   : > { %v412_v54 = vand.u32 4294901760, %v411_v53  ;;  %v5411_v2 = vshrl.u32 %v885_v0, 7  ;;  %v895_v46 = vrot.slane %v5282_v31, 1  ;;  %v5503_v0 = vld [vmem:[%s6180_s2 + $0x48] sm:$0xff] }
  0x2b   : > { %4361 = vmatpush3.bf16.msra.mxu0 %v5332_v59 }
  0x2c   : > { %4363 = vmatprep.subr.bf16.mxu0 %v5335_v60  ;;  %v4394_v38 = vpack.c.bf16 %v412_v54, %v405_v1  ;;  %6224 = vst [vmem:[#allocation6_spill] sm:$0xff] %v5411_v2  ;;  %vm896_vm0 = vcmp.lt.s32.totalorder %v5411_v2, 7  ;;  %v5456_v34 = vadd.s32 8, %v5411_v2  ;;  %vm907_vm2 = vcmp.lt.s32.totalorder %v5411_v2, 1 }
  0x2d   : > { %v897_v20 = vsel %vm896_vm0, %v894_v40, %v895_v46  ;;  %vm888_vm3 = vcmp.gt.s32.totalorder %v5411_v2, 0 }
  0x2e   : > { %6226 = vst [vmem:[#allocation8_spill] sm:$0xff] %v5456_v34  ;;  %vm891_vm1 = vcmp.lt.s32.totalorder %v5456_v34, 15 }
  0x2f   : > { %4365 = vmatpush3.bf16.msra.mxu0 %v5335_v60 }
  0x30   : > { %4367 = vmatprep.subr.bf16.mxu0 %v4366_v19 }
  0x32   : > { %3527 = vmatmul.mubr.f32.vlgmr.msra.gmra.mrb[0].mxu0 %v296_v55  ;;  %v4382_v55 = vpack.c.bf16 %v370_v26, %v363_v23  ;;  %v923_v23 = vand.u32 4294901760, %v5430_v30  ;;  %v5442_v26 = vld [vmem:[%s6180_s2 + $0x20] sm:$0xff] }
  0x33   : > { %4369 = vmatpush3.bf16.msra.mxu0 %v4366_v19  ;;  %3561 = vmatprep.mubr.f32.mxu0 %v5261_v22  ;;  %v377_v19 = vand.u32 4294901760, %v376_v24  ;;  %v898_v24 = vsel %vm896_vm0, %v895_v46, %v894_v40  ;;  %v6236_v2 = vand.u32 4294901760, %v5442_v26 }
  0x34   : > { %4371 = vmatprep.subr.bf16.mxu0 %v4370_v44 }
  0x35   : > { %v4386_v35 = vpack.c.bf16 %v384_v27, %v377_v19  ;;  %v5447_v19 = vld [vmem:[%s6180_s2 + $0x28] sm:$0xff]  ;;  %v5450_v27 = vsub.f32 %v897_v20, %v5258_v21  ;;  %v5466_v21 = vld [vmem:[%s6180_s2 + $0x30] sm:$0xff] }
  0x36   : > { %v6188_v37 = vand.u32 4294901760, %v5447_v19 }
  0x37   : > { %4373 = vmatpush3.bf16.msra.mxu0 %v4370_v44  ;;  %v391_v44 = vand.u32 4294901760, %v390_v41  ;;  %6225 = vst [vmem:[#allocation7_spill] sm:$0xff] %v5450_v27 }
  0x38   : > { %4375 = vmatprep.subr.bf16.mxu0 %v4374_v4 }
  0x39   : > { %v4390_v32 = vpack.c.bf16 %v398_v36, %v391_v44  ;;  %v6189_v36 = vand.u32 4294901760, %v5442_v26 }
  0x3b   : > { %4377 = vmatpush3.bf16.msra.mxu0 %v4374_v4  ;;  %v4402_v4 = vpack.c.bf16 %v5307_v43, %v5305_v42  ;;  %v917_v42 = vand.u32 4294901760, %v185_v14  ;;  %v920_v43 = vand.u32 4294901760, %v186_v29  ;;  %v5487_v1 = vpack.c.bf16 %v6188_v37, %v6189_v36  ;;  %v200_v37 = vld [vmem:[%s6180_s2 + $0x78] sm:$0xff] }
  0x3c   : > { %4379 = vmatprep.subr.bf16.mxu0 %v4378_v17 }
  0x3d   : > { %v5459_v44 = vpack.c.bf16 %v920_v43, %v917_v42  ;;  %6229 = vst [vmem:[#allocation11_spill] sm:$0xff] %v5487_v1 }
  0x3f   : > { %4381 = vmatpush3.bf16.msra.mxu0 %v4378_v17  ;;  %v5436_v17 = vld [vmem:[%s6180_s2 + $0x18] sm:$0xff]  ;;  %6227 = vst [vmem:[#allocation9_spill] sm:$0xff] %v5459_v44  ;;  %4527 = vmatprep.subr.bf16.mxu1 %v5459_v44 }
  0x40   : > { %4383 = vmatprep.subr.bf16.mxu0 %v4382_v55  ;;  %v926_v41 = vand.u32 4294901760, %v5436_v17  ;;  %4529 = vmatpush3.bf16.msra.mxu1 %v5459_v44 }
  0x42   : > { %v5468_v53 = vpack.c.bf16 %v926_v41, %v923_v23 }
  0x43   : > { %4385 = vmatpush3.bf16.msra.mxu0 %v4382_v55  ;;  %v4406_v55 = vpack.c.bf16 %v5329_v58, %v5326_v57  ;;  %v5473_v57 = vld [vmem:[%s6180_s2 + $0x38] sm:$0xff]  ;;  %v6187_v58 = vand.u32 4294901760, %v5466_v21 }
  0x44   : > { %4387 = vmatprep.subr.bf16.mxu0 %v4386_v35  ;;  %6228 = vst [vmem:[#allocation10_spill] sm:$0xff] %v5468_v53  ;;  %4531 = vmatprep.subr.bf16.mxu1 %v5468_v53  ;;  %v6184_v54 = vand.u32 4294901760, %v5473_v57 }
  0x45   : > { %4533 = vmatpush3.bf16.msra.mxu1 %v5468_v53  ;;  %v4426_v53 = vpack.c.bf16 %v5364_v18, %v5362_v15 }
  0x46   : > { %4535 = vmatprep.subr.bf16.mxu1 %v5487_v1  ;;  %v5516_v20 = vpack.c.bf16 %v6184_v54, %v6187_v58  ;;  %v4418_v54 = vpack.c.bf16 %v5355_v9, %v5353_v8  ;;  %v197_v9 = vld [vmem:[%s6180_s2 + $0x60] sm:$0xff]  ;;  %v5576_v58 = vsub.f32 %v5436_v17, %v926_v41 }
  0x47   : > { %4389 = vmatpush3.bf16.msra.mxu0 %v4386_v35  ;;  %v900_v35 = vsub.f32 %v898_v24, %v5282_v31  ;;  %v4410_v31 = vpack.c.bf16 %v5346_v5, %v5342_v3  ;;  %v5493_v3 = vld [vmem:[%s6180_s2 + $0x40] sm:$0xff]  ;;  %v6185_v24 = vand.u32 4294901760, %v5503_v0 }
  0x48   : > { %4391 = vmatprep.subr.bf16.mxu0 %v4390_v32  ;;  %v6186_v40 = vand.u32 4294901760, %v5493_v3  ;;  %6231 = vst [vmem:[#allocation13_spill] sm:$0xff] %v5516_v20  ;;  %v6243_v62 = vand.u32 4294901760, %v5493_v3 }
  0x49   : > { %v5497_v5 = vsel %vm891_vm1, %v900_v35, 0.0  ;;  %v5529_v35 = vld [vmem:[%s6180_s2 + $0x58] sm:$0xff]  ;;  %4537 = vmatpush3.bf16.msra.mxu1 %v5487_v1  ;;  %v6239_v1 = vand.u32 4294901760, %v5447_v19 }
  0x4a   : > { %6230 = vst [vmem:[#allocation12_spill] sm:$0xff] %v5497_v5  ;;  %4539 = vmatprep.subr.bf16.mxu1 %v5516_v20  ;;  %v950_v8 = vand.u32 4294901760, %v5529_v35 }
  0x4b   : > { %4393 = vmatpush3.bf16.msra.mxu0 %v4390_v32  ;;  %v905_v32 = vrot.slane %v5450_v27, 7 }
  0x4c   : > { %4395 = vmatprep.subr.bf16.mxu0 %v4394_v38 }
  0x4d   : > { %4541 = vmatpush3.bf16.msra.mxu1 %v5516_v20 }
  0x4f   : > { %4397 = vmatpush3.bf16.msra.mxu0 %v4394_v38  ;;  %v906_v38 = vrot.slane %v5497_v5, 7 }
  0x50   : > { %4399 = vmatprep.subr.bf16.mxu0 %v4398_v39 }
  0x51   : > { %v909_v46 = vsel %vm907_vm2, %v906_v38, %v905_v32 }
  0x52   : > { %3562 = vmatmul.mubr.f32.vlgmr.msra.gmra.mrb[0].mxu0 %v5311_v45  ;;  %v6241_v45 = vand.u32 4294901760, %v5466_v21 }
  0x53   : > { %4401 = vmatpush3.bf16.msra.mxu0 %v4398_v39  ;;  %3596 = vmatprep.mubr.f32.mxu0 %v5275_v28  ;;  %v4414_v39 = vpack.c.bf16 %v5350_v7, %v5348_v6  ;;  %v910_v6 = vadd.f32 %v909_v46, %v5450_v27  ;;  %v5537_v46 = vsub.f32 %v186_v29, %v920_v43  ;;  %v953_v27 = vand.u32 4294901760, %v197_v9 }
  0x54   : > { %4403 = vmatprep.subr.bf16.mxu0 %v4402_v4  ;;  %v5566_v43 = vsub.f32 %v5430_v30, %v923_v23  ;;  %v4422_v23 = vpack.c.bf16 %v5359_v12, %v5357_v11  ;;  %v1041_v12 = vand.u32 4294901760, %v5576_v58  ;;  %v5612_v11 = vsub.f32 %v5447_v19, %v6239_v1 }
  0x55   : > { %v5633_v63 = vsub.f32 %v5466_v21, %v6241_v45 }
  0x56   : > { %v1034_v30 = vand.u32 4294901760, %v5566_v43  ;;  %v1042_v44 = vsub.f32 %v5576_v58, %v1041_v12 }
  0x57   : > { %4405 = vmatpush3.bf16.msra.mxu0 %v4402_v4  ;;  %v908_v4 = vsel %vm907_vm2, %v905_v32, %v906_v38  ;;  %v5533_v32 = vsel %vm888_vm3, %v910_v6, 0.0  ;;  %v5535_v38 = vsub.f32 %v185_v14, %v917_v42  ;;  %v5555_v14 = vpack.c.bf16 %v6185_v24, %v6186_v40  ;;  %v198_v42 = vld [vmem:[%s6180_s2 + $0x68] sm:$0xff] }
  0x58   : > { %4407 = vmatprep.subr.bf16.mxu0 %v4406_v55  ;;  %v911_v7 = vadd.f32 %v908_v4, %v5497_v5  ;;  %6232 = vst [vmem:[#allocation14_spill] sm:$0xff] %v5533_v32  ;;  %v956_v5 = vand.u32 4294901760, %v198_v42 }
  0x59   : > { %6234 = vst [vmem:[#allocation16_spill] sm:$0xff] %v5555_v14  ;;  %4543 = vmatprep.subr.bf16.mxu1 %v5555_v14 }
  0x5a   : > { %v5541_v4 = vsel %vm891_vm1, %v911_v7, 0.0  ;;  %v199_v7 = vld [vmem:[%s6180_s2 + $0x70] sm:$0xff]  ;;  %4545 = vmatpush3.bf16.msra.mxu1 %v5555_v14  ;;  %v5663_v61 = vsub.f32 %v198_v42, %v956_v5 }
  0x5b   : > { %4409 = vmatpush3.bf16.msra.mxu0 %v4406_v55  ;;  %v5524_v55 = vld [vmem:[%s6180_s2 + $0x50] sm:$0xff]  ;;  %6233 = vst [vmem:[#allocation15_spill] sm:$0xff] %v5541_v4  ;;  %v915_v6 = vmul.f32 %v5541_v4, %v5541_v4  ;;  %v6237_v4 = vand.u32 4294901760, %v5535_v38 }
  0x5c   : > { %4411 = vmatprep.subr.bf16.mxu0 %v4410_v31  ;;  %v947_v29 = vand.u32 4294901760, %v5524_v55 }
  0x5d   : > { %v5573_v40 = vand.u32 4294901760, %v915_v6  ;;  %v1021_v34 = vsub.f32 %v5535_v38, %v6237_v4  ;;  %v6242_v4 = vand.u32 4294901760, %v5473_v57 }
  0x5e   : > { %v5590_v41 = vpack.c.bf16 %v950_v8, %v947_v29 }
  0x5f   : > { %4413 = vmatpush3.bf16.msra.mxu0 %v4410_v31  ;;  %v914_v31 = vmul.f32 %v5533_v32, %v5533_v32  ;;  %v5593_v36 = vsub.f32 %v915_v6, %v5573_v40  ;;  %v962_v32 = vand.u32 4294901760, %v200_v37  ;;  %v6238_v6 = vand.u32 4294901760, %v5537_v46 }
  0x60   : > { %4415 = vmatprep.subr.bf16.mxu0 %v4414_v39  ;;  %6235 = vst [vmem:[#allocation17_spill] sm:$0xff] %v5590_v41  ;;  %4547 = vmatprep.subr.bf16.mxu1 %v5590_v41  ;;  %v1022_v18 = vand.u32 4294901760, %v1021_v34  ;;  %v5644_v34 = vsub.f32 %v5493_v3, %v6243_v62  ;;  %v1043_v62 = vand.u32 4294901760, %v1042_v44  ;;  %v5661_v3 = vsub.f32 %v197_v9, %v953_v27 }
  0x61   : > { %v5571_v24 = vand.u32 4294901760, %v914_v31  ;;  %v1028_v20 = vsub.f32 %v5537_v46, %v6238_v6  ;;  %v1035_v6 = vsub.f32 %v5566_v43, %v1034_v30  ;;  %4549 = vmatpush3.bf16.msra.mxu1 %v5590_v41  ;;  %v6245_v45 = vand.u32 4294901760, %v5593_v36 }
  0x62   : > { %v1111_v9 = vand.u32 4294901760, %v5663_v61 }
  0x63   : > { %4417 = vmatpush3.bf16.msra.mxu0 %v4414_v39  ;;  %v5587_v17 = vsub.f32 %v914_v31, %v5571_v24  ;;  %v959_v39 = vand.u32 4294901760, %v199_v7  ;;  %v5601_v31 = vsub.f32 %v5442_v26, %v6236_v2  ;;  %v1029_v14 = vand.u32 4294901760, %v1028_v20 }
  0x64   : > { %4419 = vmatprep.subr.bf16.mxu0 %v4418_v54  ;;  %v6244_v20 = vand.u32 4294901760, %v5503_v0  ;;  %v1010_v21 = vsub.f32 %v5593_v36, %v6245_v45  ;;  %v1036_v41 = vand.u32 4294901760, %v1035_v6  ;;  %v5671_v45 = vsub.f32 %v200_v37, %v962_v32 }
  0x65   : > { %v6240_v2 = vand.u32 4294901760, %v5587_v17  ;;  %v5625_v19 = vpack.c.bf16 %v962_v32, %v959_v39  ;;  %v1048_v15 = vand.u32 4294901760, %v5601_v31  ;;  %v6246_v32 = vand.u32 4294901760, %v5535_v38 }
  0x67   : > { %4421 = vmatpush3.bf16.msra.mxu0 %v4418_v54  ;;  %v1000_v26 = vsub.f32 %v5587_v17, %v6240_v2  ;;  %v5621_v54 = vpack.c.bf16 %v956_v5, %v953_v27  ;;  %v1055_v2 = vand.u32 4294901760, %v5612_v11  ;;  %v1062_v27 = vand.u32 4294901760, %v5633_v63 }
  0x68   : > { %4423 = vmatprep.subr.bf16.mxu0 %v4422_v23  ;;  %v1076_v5 = vand.u32 4294901760, %v5644_v34 }
  0x69   : > { %v1001_v1 = vand.u32 4294901760, %v1000_v26  ;;  %v5639_v26 = vsub.f32 %v5473_v57, %v6242_v4  ;;  %4551 = vmatprep.subr.bf16.mxu1 %v5621_v54  ;;  %v5656_v57 = vsub.f32 %v5524_v55, %v947_v29  ;;  %v5659_v4 = vsub.f32 %v5529_v35, %v950_v8 }
  0x6a   : > { %v1056_v6 = vsub.f32 %v5612_v11, %v1055_v2  ;;  %4553 = vmatpush3.bf16.msra.mxu1 %v5621_v54  ;;  %v1011_v55 = vand.u32 4294901760, %v1010_v21  ;;  %v1104_v8 = vand.u32 4294901760, %v5661_v3  ;;  %v5698_v21 = vpack.c.bf16 %v1055_v2, %v1048_v15 }
  0x6b   : > { %4425 = vmatpush3.bf16.msra.mxu0 %v4422_v23  ;;  %v5649_v23 = vsub.f32 %v5503_v0, %v6244_v20  ;;  %3736 = vmatprep.mubr.f32.mxu1 %v1001_v1  ;;  %v5665_v0 = vsub.f32 %v199_v7, %v959_v39  ;;  %v5667_v1 = vpack.c.bf16 %v1029_v14, %v1022_v18  ;;  %v1069_v44 = vand.u32 4294901760, %v5639_v26 }
  0x6c   : > { %4427 = vmatprep.subr.bf16.mxu0 %v4426_v53  ;;  %v1049_v20 = vsub.f32 %v5601_v31, %v1048_v15  ;;  %4555 = vmatprep.subr.bf16.mxu1 %v5625_v19  ;;  %v1090_v35 = vand.u32 4294901760, %v5656_v57  ;;  %v1097_v37 = vand.u32 4294901760, %v5659_v4  ;;  %v6247_v14 = vand.u32 4294901760, %v5537_v46 }
  0x6d   : > { %v1118_v42 = vand.u32 4294901760, %v5665_v0  ;;  %v5692_v7 = vpack.c.bf16 %v1041_v12, %v1034_v30  ;;  %v6250_v39 = vand.u32 4294901760, %v5275_v28  ;;  %v1125_v18 = vand.u32 4294901760, %v5671_v45 }
  0x6e   : > { %v5686_v29 = vpack.c.bf16 %v6247_v14, %v6246_v32  ;;  %v5700_v32 = vpack.c.bf16 %v1069_v44, %v1062_v27  ;;  %4557 = vmatpush3.bf16.msra.mxu1 %v5625_v19  ;;  %v1050_v30 = vand.u32 4294901760, %v1049_v20  ;;  %v1057_v12 = vand.u32 4294901760, %v1056_v6 }
  0x6f   : > { %4429 = vmatpush3.bf16.msra.mxu0 %v4426_v53  ;;  %v1083_v53 = vand.u32 4294901760, %v5649_v23  ;;  %6249 = vst [vmem:[#allocation19_spill] sm:$0xff] %v5692_v7  ;;  %v5708_v7 = vpack.c.bf16 %v1097_v37, %v1090_v35  ;;  %4559 = vmatprep.subr.bf16.mxu1 %v5667_v1  ;;  %v1063_v28 = vsub.f32 %v5633_v63, %v1062_v27 }
  0x70   : > { %4431 = vmatprep.subr.bf16.mxu0 %v5218_v10  ;;  %6248 = vst [vmem:[#allocation18_spill] sm:$0xff] %v5686_v29  ;;  %v5706_v29 = vpack.c.bf16 %v1043_v62, %v1036_v41  ;;  %v1070_v15 = vsub.f32 %v5639_v26, %v1069_v44  ;;  %v5713_v2 = vpack.c.bf16 %v1111_v9, %v1104_v8 }
  0x71   : > { %v5702_v14 = vpack.c.bf16 %v1083_v53, %v1076_v5  ;;  %3737 = vmatmul.mubr.f32.vlgmr.msra.gmra.mrb[0].mxu1 %v1011_v55  ;;  %v5720_v41 = vpack.c.bf16 %v1057_v12, %v1050_v30  ;;  %v1064_v62 = vand.u32 4294901760, %v1063_v28  ;;  %v1077_v6 = vsub.f32 %v5644_v34, %v1076_v5 }
  0x72   : > { %3597 = vmatmul.mubr.f32.vlgmr.msra.gmra.mrb[0].mxu0 %v5323_v56  ;;  %4561 = vmatpush3.bf16.msra.mxu1 %v5667_v1  ;;  %v1071_v20 = vand.u32 4294901760, %v1070_v15  ;;  %v1084_v27 = vsub.f32 %v5649_v23, %v1083_v53  ;;  %v1091_v44 = vsub.f32 %v5656_v57, %v1090_v35  ;;  %v1098_v55 = vsub.f32 %v5659_v4, %v1097_v37 }
  0x73   : > { %4433 = vmatpush3.bf16.msra.mxu0 %v5218_v10  ;;  %3631 = vmatprep.mubr.f32.mxu0 %v6250_v39  ;;  %v5715_v39 = vpack.c.bf16 %v1125_v18, %v1118_v42  ;;  %v1078_v12 = vand.u32 4294901760, %v1077_v6  ;;  %v1105_v35 = vsub.f32 %v5661_v3, %v1104_v8  ;;  %v1112_v37 = vsub.f32 %v5663_v61, %v1111_v9 }
  0x74   : > { %4435 = vmatprep.subr.bf16.mxu0 %v5222_v13  ;;  %4563 = vmatprep.subr.bf16.mxu1 %v5706_v29  ;;  %v5732_v30 = vpack.c.bf16 %v1071_v20, %v1064_v62  ;;  %v1085_v5 = vand.u32 4294901760, %v1084_v27  ;;  %v1092_v53 = vand.u32 4294901760, %v1091_v44  ;;  %v1099_v28 = vand.u32 4294901760, %v1098_v55 }
  0x75   : > { %3771 = vmatprep.mubr.f32.mxu1 %v5571_v24  ;;  %v1106_v20 = vand.u32 4294901760, %v1105_v35  ;;  %v1113_v6 = vand.u32 4294901760, %v1112_v37  ;;  %v1119_v27 = vsub.f32 %v5665_v0, %v1118_v42  ;;  %v1126_v44 = vsub.f32 %v5671_v45, %v1125_v18 }
  0x76   : > { %4565 = vmatpush3.bf16.msra.mxu1 %v5706_v29  ;;  %v5738_v15 = vpack.c.bf16 %v1085_v5, %v1078_v12  ;;  %v5745_v62 = vpack.c.bf16 %v1099_v28, %v1092_v53  ;;  %v5768_v18 = vpack.c.bf16 %v5537_v46, %v5535_v38  ;;  %v6251_v12 = vand.u32 4294901760, %v5323_v56  ;;  %v6256_v46 = vld [vmem:[#allocation9_spill] sm:$0xff] }
  0x77   : > { %4437 = vmatpush3.bf16.msra.mxu0 %v5222_v13  ;;  %4567 = vmatprep.subr.bf16.mxu1 %v5720_v41  ;;  %v5754_v8 = vpack.c.bf16 %v1113_v6, %v1106_v20  ;;  %v1120_v9 = vand.u32 4294901760, %v1119_v27  ;;  %v1127_v55 = vand.u32 4294901760, %v1126_v44  ;;  %v5779_v5 = vpack.c.bf16 %v5576_v58, %v5566_v43  ;;  %v6254_v58 = vld [vmem:[#allocation5_spill] sm:$0xff]  ;;  %v6257_v43 = vld [vmem:[#allocation10_spill] sm:$0xff] }
  0x78   : > { %4439 = vmatprep.subr.bf16.mxu0 %v5242_v16  ;;  %v5788_v56 = vpack.c.bf16 %v5612_v11, %v5601_v31  ;;  %v5829_v38 = vpack.c.bf16 %v5671_v45, %v5665_v0 }
  0x79   : > { %v5760_v42 = vpack.c.bf16 %v1127_v55, %v1120_v9  ;;  %v5154_v55 = vld [vmem:[%s5255_s11 + $0x8] sm:$0xff] }
  0x7a   : > { %4569 = vmatpush3.bf16.msra.mxu1 %v5720_v41 }
  0x7b   : > { %4441 = vmatpush3.bf16.msra.mxu0 %v5242_v16  ;;  %4571 = vmatprep.subr.bf16.mxu1 %v5732_v30 }
  0x7c   : > { %4443 = vmatprep.subr.bf16.mxu0 %v5265_v25 }
  0x7e   : > { %4573 = vmatpush3.bf16.msra.mxu1 %v5732_v30 }
  0x7f   : > { %4445 = vmatpush3.bf16.msra.mxu0 %v5265_v25  ;;  %4575 = vmatprep.subr.bf16.mxu1 %v5738_v15 }
  0x80   : > { %4447 = vmatprep.subr.bf16.mxu0 %v5286_v33 }
  0x82   : > { %4577 = vmatpush3.bf16.msra.mxu1 %v5738_v15 }
  0x83   : > { %4449 = vmatpush3.bf16.msra.mxu0 %v5286_v33  ;;  %4579 = vmatprep.subr.bf16.mxu1 %v5745_v62 }
  0x84   : > { %4451 = vmatprep.subr.bf16.mxu0 %v5315_v51 }
  0x86   : > { %4581 = vmatpush3.bf16.msra.mxu1 %v5745_v62 }
  0x87   : > { %4453 = vmatpush3.bf16.msra.mxu0 %v5315_v51  ;;  %4583 = vmatprep.subr.bf16.mxu1 %v5754_v8 }
  0x88   : > { %4455 = vmatprep.subr.bf16.mxu0 %v5332_v59 }
  0x8a   : > { %4585 = vmatpush3.bf16.msra.mxu1 %v5754_v8 }
  0x8b   : > { %4457 = vmatpush3.bf16.msra.mxu0 %v5332_v59  ;;  %4587 = vmatprep.subr.bf16.mxu1 %v5760_v42 }
  0x8c   : > { %4459 = vmatprep.subr.bf16.mxu0 %v5335_v60 }
  0x8e   : > { %4589 = vmatpush3.bf16.msra.mxu1 %v5760_v42 }
  0x8f   : > { %4461 = vmatpush3.bf16.msra.mxu0 %v5335_v60  ;;  %4591 = vmatprep.subr.bf16.mxu1 %v5768_v18 }
  0x90   : > { %4463 = vmatprep.subr.bf16.mxu0 %v5383_v47 }
  0x91   : > { %3772 = vmatmul.mubr.f32.vlgmr.msra.gmra.mrb[0].mxu1 %v5573_v40 }
  0x92   : > { %3632 = vmatmul.mubr.f32.vlgmr.msra.gmra.mrb[0].mxu0 %v6251_v12  ;;  %4593 = vmatpush3.bf16.msra.mxu1 %v5768_v18  ;;  %v2299_v12 = vmul.f32 0.5, %v5154_v55 }
  0x93   : > { %4465 = vmatpush3.bf16.msra.mxu0 %v5383_v47  ;;  %3666 = vmatprep.mubr.f32.mxu0 %v5261_v22  ;;  %v5797_v47 = vpack.c.bf16 %v5639_v26, %v5633_v63  ;;  %v6253_v63 = vld [vmem:[#allocation4_spill] sm:$0xff] }
  0x94   : > { %4467 = vmatprep.subr.bf16.mxu0 %v5385_v48  ;;  %4595 = vmatprep.subr.bf16.mxu1 %v5779_v5 }
  0x95   : > { %3806 = vmatprep.mubr.f32.mxu1 %v5587_v17 }
  0x96   : > { %4597 = vmatpush3.bf16.msra.mxu1 %v5779_v5 }
  0x97   : > { %4469 = vmatpush3.bf16.msra.mxu0 %v5385_v48  ;;  %4599 = vmatprep.subr.bf16.mxu1 %v5788_v56  ;;  %v5805_v48 = vpack.c.bf16 %v5649_v23, %v5644_v34  ;;  %v6269_v34 = vld [vmem:[#allocation14_spill] sm:$0xff] }
  0x98   : > { %4471 = vmatprep.subr.bf16.mxu0 %v5387_v49 }
  0x9a   : > { %4601 = vmatpush3.bf16.msra.mxu1 %v5788_v56 }
  0x9b   : > { %4473 = vmatpush3.bf16.msra.mxu0 %v5387_v49  ;;  %4603 = vmatprep.subr.bf16.mxu1 %v5797_v47  ;;  %v6252_v49 = vld [vmem:[#allocation3_spill] sm:$0xff] }
  0x9c   : > { %4475 = vmatprep.subr.bf16.mxu0 %v5389_v50 }
  0x9e   : > { %4605 = vmatpush3.bf16.msra.mxu1 %v5797_v47 }
  0x9f   : > { %4477 = vmatpush3.bf16.msra.mxu0 %v5389_v50  ;;  %4607 = vmatprep.subr.bf16.mxu1 %v5805_v48  ;;  %v5813_v50 = vpack.c.bf16 %v5659_v4, %v5656_v57 }
  0xa0   : > { %4479 = vmatprep.subr.bf16.mxu0 %v5391_v52 }
  0xa2   : > { %4609 = vmatpush3.bf16.msra.mxu1 %v5805_v48 }
  0xa3   : > { %4481 = vmatpush3.bf16.msra.mxu0 %v5391_v52  ;;  %4611 = vmatprep.subr.bf16.mxu1 %v5813_v50  ;;  %v5821_v52 = vpack.c.bf16 %v5663_v61, %v5661_v3  ;;  %v6255_v61 = vld [vmem:[#allocation2_spill] sm:$0xff] }
  0xa4   : > { %4483 = vmatprep.subr.bf16.mxu0 %v6252_v49 }
  0xa6   : > { %4613 = vmatpush3.bf16.msra.mxu1 %v5813_v50 }
  0xa7   : > { %4485 = vmatpush3.bf16.msra.mxu0 %v6252_v49  ;;  %4615 = vmatprep.subr.bf16.mxu1 %v5821_v52  ;;  %v6270_v49 = vld [vmem:[#allocation12_spill] sm:$0xff] }
  0xa8   : > { %4487 = vmatprep.subr.bf16.mxu0 %v6253_v63 }
  0xaa   : > { %4617 = vmatpush3.bf16.msra.mxu1 %v5821_v52 }
  0xab   : > { %4489 = vmatpush3.bf16.msra.mxu0 %v6253_v63  ;;  %4619 = vmatprep.subr.bf16.mxu1 %v5829_v38  ;;  %v2303_v63 = vmul.f32 8.0, %v6270_v49 }
  0xac   : > { %4491 = vmatprep.subr.bf16.mxu0 %v6254_v58 }
  0xae   : > { %4621 = vmatpush3.bf16.msra.mxu1 %v5829_v38 }
  0xaf   : > { %4493 = vmatpush3.bf16.msra.mxu0 %v6254_v58  ;;  %4623 = vmatprep.subr.bf16.mxu1 %v6256_v46 }
  0xb0   : > { %4495 = vmatprep.subr.bf16.mxu0 %v5218_v10 }
  0xb1   : > { %3807 = vmatmul.mubr.f32.vlgmr.msra.gmra.mrb[0].mxu1 %v5593_v36 }
  0xb2   : > { %3667 = vmatmul.mubr.f32.vlgmr.msra.gmra.mrb[0].mxu0 %v6255_v61  ;;  %4625 = vmatpush3.bf16.msra.mxu1 %v6256_v46 }
  0xb3   : > { %4497 = vmatpush3.bf16.msra.mxu0 %v5218_v10  ;;  %3701 = vmatprep.mubr.f32.mxu0 %v5261_v22  ;;  %v6258_v10 = vand.u32 4294901760, %v5587_v17  ;;  %v6259_v22 = vld [vmem:[#allocation11_spill] sm:$0xff] }
  0xb4   : > { %4499 = vmatprep.subr.bf16.mxu0 %v5222_v13  ;;  %4627 = vmatprep.subr.bf16.mxu1 %v6257_v43  ;;  %v6267_v17 = vld [vmem:[#allocation15_spill] sm:$0xff] }
  0xb5   : > { %3841 = vmatprep.mubr.f32.mxu1 %v6258_v10 }
  0xb6   : > { %4629 = vmatpush3.bf16.msra.mxu1 %v6257_v43 }
  0xb7   : > { %4501 = vmatpush3.bf16.msra.mxu0 %v5222_v13  ;;  %4631 = vmatprep.subr.bf16.mxu1 %v6259_v22  ;;  %v6260_v13 = vld [vmem:[#allocation13_spill] sm:$0xff] }
  0xb8   : > { %4503 = vmatprep.subr.bf16.mxu0 %v5242_v16 }
  0xba   : > { %4633 = vmatpush3.bf16.msra.mxu1 %v6259_v22 }
  0xbb   : > { %4505 = vmatpush3.bf16.msra.mxu0 %v5242_v16  ;;  %4635 = vmatprep.subr.bf16.mxu1 %v6260_v13  ;;  %v6261_v16 = vld [vmem:[#allocation16_spill] sm:$0xff] }
  0xbc   : > { %4507 = vmatprep.subr.bf16.mxu0 %v5265_v25 }
  0xbe   : > { %4637 = vmatpush3.bf16.msra.mxu1 %v6260_v13 }
  0xbf   : > { %4509 = vmatpush3.bf16.msra.mxu0 %v5265_v25  ;;  %4639 = vmatprep.subr.bf16.mxu1 %v6261_v16  ;;  %v6262_v25 = vld [vmem:[#allocation17_spill] sm:$0xff] }
  0xc0   : > { %4511 = vmatprep.subr.bf16.mxu0 %v5286_v33 }
  0xc2   : > { %4641 = vmatpush3.bf16.msra.mxu1 %v6261_v16 }
  0xc3   : > { %4513 = vmatpush3.bf16.msra.mxu0 %v5286_v33  ;;  %4643 = vmatprep.subr.bf16.mxu1 %v6262_v25  ;;  %v6263_v33 = vld [vmem:[#allocation18_spill] sm:$0xff] }
  0xc4   : > { %4515 = vmatprep.subr.bf16.mxu0 %v5315_v51 }
  0xc6   : > { %4645 = vmatpush3.bf16.msra.mxu1 %v6262_v25 }
  0xc7   : > { %4517 = vmatpush3.bf16.msra.mxu0 %v5315_v51  ;;  %4647 = vmatprep.subr.bf16.mxu1 %v5621_v54  ;;  %v6264_v51 = vand.u32 4294901760, %v5593_v36 }
  0xc8   : > { %4519 = vmatprep.subr.bf16.mxu0 %v5332_v59 }
  0xca   : > { %4649 = vmatpush3.bf16.msra.mxu1 %v5621_v54 }
  0xcb   : > { %4521 = vmatpush3.bf16.msra.mxu0 %v5332_v59  ;;  %4651 = vmatprep.subr.bf16.mxu1 %v5625_v19  ;;  %v6265_v59 = vld [vmem:[#allocation19_spill] sm:$0xff] }
  0xcc   : > { %4523 = vmatprep.subr.bf16.mxu0 %v5335_v60 }
  0xce   : > { %4653 = vmatpush3.bf16.msra.mxu1 %v5625_v19 }
  0xcf   : > { %4525 = vmatpush3.bf16.msra.mxu0 %v5335_v60  ;;  %4655 = vmatprep.subr.bf16.mxu1 %v6263_v33 }
  0xd0   : > { %4719 = vmatprep.subr.bf16.mxu0 %v6256_v46 }
  0xd1   : > { %3842 = vmatmul.mubr.f32.vlgmr.msra.gmra.mrb[0].mxu1 %v6264_v51  ;;  %v6271_v51 = vld [vmem:[#allocation7_spill] sm:$0xff] }
  0xd2   : > { %3702 = vmatmul.mubr.f32.vlgmr.msra.gmra.mrb[0].mxu0 %v6255_v61  ;;  %4657 = vmatpush3.bf16.msra.mxu1 %v6263_v33  ;;  %v5155_v61 = vld [vmem:[%s5255_s11] sm:$0xff]  ;;  %v2302_v36 = vmul.f32 8.0, %v6271_v51 }
  0xd3   : > { %4721 = vmatpush3.bf16.msra.mxu0 %v6256_v46  ;;  %3876 = vmatprep.mubr.f32.mxu1 %v5571_v24  ;;  %v2298_v10 = vmul.f32 0.5, %v5155_v61 }
  0xd4   : > { %4723 = vmatprep.subr.bf16.mxu0 %v6257_v43  ;;  %4659 = vmatprep.subr.bf16.mxu1 %v6265_v59 }
  0xd6   : > { %4661 = vmatpush3.bf16.msra.mxu1 %v6265_v59 }
  0xd7   : > { %4725 = vmatpush3.bf16.msra.mxu0 %v6257_v43  ;;  %4663 = vmatprep.subr.bf16.mxu1 %v5698_v21 }
  0xd8   : > { %4727 = vmatprep.subr.bf16.mxu0 %v6259_v22 }
  0xda   : > { %4665 = vmatpush3.bf16.msra.mxu1 %v5698_v21 }
  0xdb   : > { %4729 = vmatpush3.bf16.msra.mxu0 %v6259_v22  ;;  %4667 = vmatprep.subr.bf16.mxu1 %v5700_v32 }
  0xdc   : > { %4731 = vmatprep.subr.bf16.mxu0 %v6260_v13 }
  0xde   : > { %4669 = vmatpush3.bf16.msra.mxu1 %v5700_v32 }
  0xdf   : > { %4733 = vmatpush3.bf16.msra.mxu0 %v6260_v13  ;;  %4671 = vmatprep.subr.bf16.mxu1 %v5702_v14 }
  0xe0   : > { %4735 = vmatprep.subr.bf16.mxu0 %v6261_v16 }
  0xe2   : > { %4673 = vmatpush3.bf16.msra.mxu1 %v5702_v14 }
  0xe3   : > { %4737 = vmatpush3.bf16.msra.mxu0 %v6261_v16  ;;  %4675 = vmatprep.subr.bf16.mxu1 %v5708_v7 }
  0xe4   : > { %4739 = vmatprep.subr.bf16.mxu0 %v6262_v25 }
  0xe6   : > { %4677 = vmatpush3.bf16.msra.mxu1 %v5708_v7 }
  0xe7   : > { %4741 = vmatpush3.bf16.msra.mxu0 %v6262_v25  ;;  %4679 = vmatprep.subr.bf16.mxu1 %v5713_v2 }
  0xe8   : > { %4743 = vmatprep.subr.bf16.mxu0 %v5621_v54 }
  0xea   : > { %4681 = vmatpush3.bf16.msra.mxu1 %v5713_v2 }
  0xeb   : > { %4745 = vmatpush3.bf16.msra.mxu0 %v5621_v54  ;;  %4683 = vmatprep.subr.bf16.mxu1 %v5715_v39 }
  0xec   : > { %4747 = vmatprep.subr.bf16.mxu0 %v5625_v19 }
  0xee   : > { %4685 = vmatpush3.bf16.msra.mxu1 %v5715_v39 }
  0xef   : > { %4749 = vmatpush3.bf16.msra.mxu0 %v5625_v19  ;;  %4687 = vmatprep.subr.bf16.mxu1 %v6256_v46 }
  0xf0   : > { %4751 = vmatprep.subr.bf16.mxu0 %v5667_v1 }
  0xf1   : > { %3877 = vmatmul.mubr.f32.vlgmr.msra.gmra.mrb[0].mxu1 %v5573_v40 }
  0xf2   : > { %4689 = vmatpush3.bf16.msra.mxu1 %v6256_v46  ;;  %3911 = vmatprep.mubr.f32.mxu1 %v5571_v24 }
  0xf3   : > { %4691 = vmatprep.subr.bf16.mxu1 %v6257_v43 }
  0xf6   : > { %4693 = vmatpush3.bf16.msra.mxu1 %v6257_v43 }
  0xf7   : > { %4695 = vmatprep.subr.bf16.mxu1 %v6259_v22 }
  0xfa   : > { %4697 = vmatpush3.bf16.msra.mxu1 %v6259_v22 }
  0xfb   : > { %4699 = vmatprep.subr.bf16.mxu1 %v6260_v13 }
  0xfe   : > { %4701 = vmatpush3.bf16.msra.mxu1 %v6260_v13 }
  0xff   : > { %4703 = vmatprep.subr.bf16.mxu1 %v6261_v16 }
 0x102   : > { %4705 = vmatpush3.bf16.msra.mxu1 %v6261_v16 }
 0x103   : > { %4707 = vmatprep.subr.bf16.mxu1 %v6262_v25 }
 0x106   : > { %4709 = vmatpush3.bf16.msra.mxu1 %v6262_v25 }
 0x107   : > { %4711 = vmatprep.subr.bf16.mxu1 %v5621_v54 }
 0x10a   : > { %4713 = vmatpush3.bf16.msra.mxu1 %v5621_v54 }
 0x10b   : > { %4715 = vmatprep.subr.bf16.mxu1 %v5625_v19 }
 0x10e   : > { %4717 = vmatpush3.bf16.msra.mxu1 %v5625_v19 }
 0x10f   : > { %4911 = vmatprep.subr.bf16.mxu1 %v6256_v46 }
 0x111   : > { %3912 = vmatmul.mubr.f32.vlgmr.msra.gmra.mrb[0].mxu1 %v5573_v40 }
 0x112   : > { %4913 = vmatpush3.bf16.msra.mxu1 %v6256_v46 }
 0x113   : > { %4915 = vmatprep.subr.bf16.mxu1 %v6257_v43 }
 0x116   : > { %4917 = vmatpush3.bf16.msra.mxu1 %v6257_v43 }
 0x117   : > { %4919 = vmatprep.subr.bf16.mxu1 %v6259_v22 }
 0x11a   : > { %4921 = vmatpush3.bf16.msra.mxu1 %v6259_v22 }
 0x11b   : > { %4923 = vmatprep.subr.bf16.mxu1 %v6260_v13 }
 0x11e   : > { %4925 = vmatpush3.bf16.msra.mxu1 %v6260_v13 }
 0x11f   : > { %4927 = vmatprep.subr.bf16.mxu1 %v6261_v16 }
 0x122   : > { %4929 = vmatpush3.bf16.msra.mxu1 %v6261_v16 }
 0x123   : > { %4931 = vmatprep.subr.bf16.mxu1 %v6262_v25 }
 0x126   : > { %4933 = vmatpush3.bf16.msra.mxu1 %v6262_v25 }
 0x127   : > { %4935 = vmatprep.subr.bf16.mxu1 %v5621_v54 }
 0x12a   : > { %4937 = vmatpush3.bf16.msra.mxu1 %v5621_v54 }
 0x12b   : > { %4939 = vmatprep.subr.bf16.mxu1 %v5625_v19 }
 0x12e   : > { %4941 = vmatpush3.bf16.msra.mxu1 %v5625_v19 }
 0x12f   : > { %4943 = vmatprep.subr.bf16.mxu1 %v5667_v1 }
 0x1a5   : > { %v5945_v60 = vpop.f32.mrb[0].mxu0 }
 0x1a6   : > { %v5950_v40 = vsel %vm891_vm1, %v5945_v60, 0.0  ;;  %v5952_v24 = vpop.f32.mrb[1].mxu0 }
 0x1a7   : > { %v1601_v11 = vmul.f32 %v6267_v17, %v5950_v40  ;;  %v5959_v26 = vsel %vm888_vm3, %v5952_v24, 0.0 }
 0x1a8   : > { %v1600_v23 = vmul.f32 %v6269_v34, %v5959_v26 }
 0x1a9   : > { %v5963_v57 = vand.u32 4294901760, %v1601_v11 }
 0x1aa   : > { %v5965_v4 = vand.u32 4294901760, %v1600_v23 }
 0x1ab   : > { %v5968_v3 = vsub.f32 %v1601_v11, %v5963_v57 }
 0x1ac   : > { %v1684_v0 = vsub.f32 %v1600_v23, %v5965_v4 }
 0x1ad   : > { %v1695_v45 = vand.u32 4294901760, %v5968_v3 }
 0x1ae   : > { %v1685_v53 = vand.u32 4294901760, %v1684_v0 }
 0x1af   : > { %v1696_v28 = vsub.f32 %v5968_v3, %v1695_v45 }
 0x1b0   : > { %v1686_v35 = vsub.f32 %v1684_v0, %v1685_v53 }
 0x1b1   : > { %v1697_v20 = vand.u32 4294901760, %v1696_v28  ;;  %v2304_v28 = vmul.f32 %v2302_v36, %v6271_v51 }
 0x1b2   : > { %v1687_v37 = vand.u32 4294901760, %v1686_v35 }
 0x1b4   : > { %3946 = vmatprep.mubr.f32.mxu0 %v1687_v37 }
 0x1b5   : > { %3947 = vmatmul.mubr.f32.vlgmr.msra.gmra.mrb[2].mxu0 %v1697_v20 }
 0x1b6   : > { %4753 = vmatpush3.bf16.msra.mxu0 %v5667_v1  ;;  %3981 = vmatprep.mubr.f32.mxu0 %v5965_v4 }
 0x1b7   : > { %4755 = vmatprep.subr.bf16.mxu0 %v5706_v29 }
 0x1ba   : > { %4757 = vmatpush3.bf16.msra.mxu0 %v5706_v29 }
 0x1bb   : > { %4759 = vmatprep.subr.bf16.mxu0 %v5720_v41 }
 0x1be   : > { %4761 = vmatpush3.bf16.msra.mxu0 %v5720_v41 }
 0x1bf   : > { %4763 = vmatprep.subr.bf16.mxu0 %v5732_v30 }
 0x1c2   : > { %4765 = vmatpush3.bf16.msra.mxu0 %v5732_v30 }
 0x1c3   : > { %4767 = vmatprep.subr.bf16.mxu0 %v5738_v15 }
 0x1c6   : > { %4769 = vmatpush3.bf16.msra.mxu0 %v5738_v15 }
 0x1c7   : > { %4771 = vmatprep.subr.bf16.mxu0 %v5745_v62 }
 0x1ca   : > { %4773 = vmatpush3.bf16.msra.mxu0 %v5745_v62 }
 0x1cb   : > { %4775 = vmatprep.subr.bf16.mxu0 %v5754_v8 }
 0x1ce   : > { %4777 = vmatpush3.bf16.msra.mxu0 %v5754_v8 }
 0x1cf   : > { %4779 = vmatprep.subr.bf16.mxu0 %v5760_v42 }
 0x1d2   : > { %4781 = vmatpush3.bf16.msra.mxu0 %v5760_v42 }
 0x1d3   : > { %4783 = vmatprep.subr.bf16.mxu0 %v5768_v18 }
 0x1d5   : > { %3982 = vmatmul.mubr.f32.vlgmr.msra.gmra.mrb[2].mxu0 %v5963_v57 }
 0x1d6   : > { %4785 = vmatpush3.bf16.msra.mxu0 %v5768_v18  ;;  %4016 = vmatprep.mubr.f32.mxu0 %v1684_v0  ;;  %v2305_v0 = vmul.f32 %v2303_v63, %v6270_v49 }
 0x1d7   : > { %4787 = vmatprep.subr.bf16.mxu0 %v5779_v5 }
 0x1da   : > { %4789 = vmatpush3.bf16.msra.mxu0 %v5779_v5 }
 0x1db   : > { %4791 = vmatprep.subr.bf16.mxu0 %v5788_v56 }
 0x1de   : > { %4793 = vmatpush3.bf16.msra.mxu0 %v5788_v56 }
 0x1df   : > { %4795 = vmatprep.subr.bf16.mxu0 %v5797_v47 }
 0x1e2   : > { %4797 = vmatpush3.bf16.msra.mxu0 %v5797_v47 }
 0x1e3   : > { %4799 = vmatprep.subr.bf16.mxu0 %v5805_v48 }
 0x1e4   : > { %v6002_v6 = vpop.f32.mrb[0].mxu1 }
 0x1e5   : > { %v1590_v27 = vpop.f32.mrb[1].mxu1  ;;  %vm2287_vm4 = vcmp.gt.f32.partialorder %v6002_v6, 0.0 }
 0x1e6   : > { %4801 = vmatpush3.bf16.msra.mxu0 %v5805_v48  ;;  %vm2286_vm5 = vcmp.gt.f32.partialorder %v1590_v27, 0.0  ;;  %v2289_v44 = vsel %vm2287_vm4, %v6002_v6, 1.0 }
 0x1e7   : > { %4803 = vmatprep.subr.bf16.mxu0 %v5813_v50  ;;  %v2288_v9 = vsel %vm2286_vm5, %v1590_v27, 1.0  ;;  %5150 = vrcp.f32 %v2289_v44 }
 0x1e8   : > { %5152 = vrcp.f32 %v2288_v9 }
 0x1ea   : > { %4805 = vmatpush3.bf16.msra.mxu0 %v5813_v50 }
 0x1eb   : > { %4807 = vmatprep.subr.bf16.mxu0 %v5821_v52 }
 0x1ee   : > { %4809 = vmatpush3.bf16.msra.mxu0 %v5821_v52 }
 0x1ef   : > { %4811 = vmatprep.subr.bf16.mxu0 %v5829_v38 }
 0x1f1   : > { %v5151_v58 = vpop.eup %5150 }
 0x1f2   : > { %4813 = vmatpush3.bf16.msra.mxu0 %v5829_v38  ;;  %v5153_v31 = vpop.eup %5152 }
 0x1f3   : > { %4815 = vmatprep.subr.bf16.mxu0 %v6256_v46 }
 0x1f5   : > { %4017 = vmatmul.mubr.f32.vlgmr.msra.gmra.mrb[2].mxu0 %v5968_v3  ;;  %v2301_v3 = vmul.f32 %v5945_v60, %v2299_v12 }
 0x1f6   : > { %4817 = vmatpush3.bf16.msra.mxu0 %v6256_v46  ;;  %4051 = vmatprep.mubr.f32.mxu0 %v1685_v53  ;;  %v2300_v53 = vmul.f32 %v2298_v10, %v5952_v24 }
 0x1f7   : > { %4819 = vmatprep.subr.bf16.mxu0 %v6257_v43  ;;  %v2307_v6 = vadd.f32 %v2305_v0, %v2301_v3 }
 0x1f8   : > { %v2306_v44 = vadd.f32 %v2304_v28, %v2300_v53 }
 0x1fa   : > { %4821 = vmatpush3.bf16.msra.mxu0 %v6257_v43 }
 0x1fb   : > { %4823 = vmatprep.subr.bf16.mxu0 %v6259_v22 }
 0x1fe   : > { %4825 = vmatpush3.bf16.msra.mxu0 %v6259_v22 }
 0x1ff   : > { %4827 = vmatprep.subr.bf16.mxu0 %v6260_v13 }
 0x202   : > { %4829 = vmatpush3.bf16.msra.mxu0 %v6260_v13 }
 0x203   : > { %4831 = vmatprep.subr.bf16.mxu0 %v6261_v16 }
 0x206   : > { %4833 = vmatpush3.bf16.msra.mxu0 %v6261_v16 }
 0x207   : > { %4835 = vmatprep.subr.bf16.mxu0 %v6262_v25 }
 0x20a   : > { %4837 = vmatpush3.bf16.msra.mxu0 %v6262_v25 }
 0x20b   : > { %4839 = vmatprep.subr.bf16.mxu0 %v5621_v54 }
 0x20e   : > { %4841 = vmatpush3.bf16.msra.mxu0 %v5621_v54 }
 0x20f   : > { %4843 = vmatprep.subr.bf16.mxu0 %v5625_v19 }
 0x212   : > { %4845 = vmatpush3.bf16.msra.mxu0 %v5625_v19 }
 0x213   : > { %4847 = vmatprep.subr.bf16.mxu0 %v6263_v33 }
 0x215   : > { %4052 = vmatmul.mubr.f32.vlgmr.msra.gmra.mrb[2].mxu0 %v1695_v45 }
 0x216   : > { %4849 = vmatpush3.bf16.msra.mxu0 %v6263_v33  ;;  %4086 = vmatprep.mubr.f32.mxu0 %v5965_v4 }
 0x217   : > { %4851 = vmatprep.subr.bf16.mxu0 %v6265_v59 }
 0x21a   : > { %4853 = vmatpush3.bf16.msra.mxu0 %v6265_v59 }
 0x21b   : > { %4855 = vmatprep.subr.bf16.mxu0 %v5698_v21 }
 0x21e   : > { %4857 = vmatpush3.bf16.msra.mxu0 %v5698_v21 }
 0x21f   : > { %4859 = vmatprep.subr.bf16.mxu0 %v5700_v32 }
 0x222   : > { %4861 = vmatpush3.bf16.msra.mxu0 %v5700_v32 }
 0x223   : > { %4863 = vmatprep.subr.bf16.mxu0 %v5702_v14 }
 0x226   : > { %4865 = vmatpush3.bf16.msra.mxu0 %v5702_v14 }
 0x227   : > { %4867 = vmatprep.subr.bf16.mxu0 %v5708_v7 }
 0x22a   : > { %4869 = vmatpush3.bf16.msra.mxu0 %v5708_v7 }
 0x22b   : > { %4871 = vmatprep.subr.bf16.mxu0 %v5713_v2 }
 0x22e   : > { %4873 = vmatpush3.bf16.msra.mxu0 %v5713_v2 }
 0x22f   : > { %4875 = vmatprep.subr.bf16.mxu0 %v5715_v39 }
 0x232   : > { %4877 = vmatpush3.bf16.msra.mxu0 %v5715_v39 }
 0x233   : > { %4879 = vmatprep.subr.bf16.mxu0 %v6256_v46 }
 0x235   : > { %4087 = vmatmul.mubr.f32.vlgmr.msra.gmra.mrb[2].mxu0 %v5963_v57 }
 0x236   : > { %4881 = vmatpush3.bf16.msra.mxu0 %v6256_v46  ;;  %4121 = vmatprep.mubr.f32.mxu0 %v5965_v4 }
 0x237   : > { %4883 = vmatprep.subr.bf16.mxu0 %v6257_v43 }
 0x23a   : > { %4885 = vmatpush3.bf16.msra.mxu0 %v6257_v43 }
 0x23b   : > { %4887 = vmatprep.subr.bf16.mxu0 %v6259_v22 }
 0x23e   : > { %4889 = vmatpush3.bf16.msra.mxu0 %v6259_v22 }
 0x23f   : > { %4891 = vmatprep.subr.bf16.mxu0 %v6260_v13 }
 0x242   : > { %4893 = vmatpush3.bf16.msra.mxu0 %v6260_v13 }
 0x243   : > { %4895 = vmatprep.subr.bf16.mxu0 %v6261_v16 }
 0x246   : > { %4897 = vmatpush3.bf16.msra.mxu0 %v6261_v16 }
 0x247   : > { %4899 = vmatprep.subr.bf16.mxu0 %v6262_v25 }
 0x24a   : > { %4901 = vmatpush3.bf16.msra.mxu0 %v6262_v25 }
 0x24b   : > { %4903 = vmatprep.subr.bf16.mxu0 %v5621_v54 }
 0x24e   : > { %4905 = vmatpush3.bf16.msra.mxu0 %v5621_v54 }
 0x24f   : > { %4907 = vmatprep.subr.bf16.mxu0 %v5625_v19 }
 0x252   : > { %4909 = vmatpush3.bf16.msra.mxu0 %v5625_v19 }
 0x255   : > { %4122 = vmatmul.mubr.f32.vlgmr.msra.gmra.mrb[2].mxu0 %v5963_v57 }
 0x328   : > { %v4123_v11 = vpop.f32.mrb[2].mxu0 }
 0x329   : > { %v2293_v23 = vmul.f32 %v5151_v58, %v4123_v11  ;;  %v2276_v57 = vpop.f32.mrb[3].mxu0 }
 0x32a   : > { %v2292_v4 = vmul.f32 %v5153_v31, %v2276_v57 }
 0x32b   : > { %v2295_v45 = vmul.f32 %v2293_v23, %v6267_v17 }
 0x32c   : > { %v2294_v35 = vmul.f32 %v2292_v4, %v6269_v34 }
 0x32d   : > { %v2297_v37 = vsub.f32 %v5950_v40, %v2295_v45 }
 0x32e   : > { %v2296_v20 = vsub.f32 %v5959_v26, %v2294_v35 }
 0x32f   : > { %v2309_v27 = vand.u32 2147483647, %v2297_v37 }
 0x330   : > { %v2308_v9 = vand.u32 2147483647, %v2296_v20 }
 0x331   : > { %v2311_v55 = vadd.f32 %v2309_v27, %v2307_v6 }
 0x332   : > { %v2310_v60 = vadd.f32 %v2308_v9, %v2306_v44 }
 0x333   : > { %v6075_v12 = vand.u32 4294901760, %v2311_v55 }
 0x334   : > { %v6077_v49 = vand.u32 4294901760, %v2310_v60 }
 0x335   : > { %v6080_v24 = vsub.f32 %v2311_v55, %v6075_v12 }
 0x336   : > { %v2394_v17 = vsub.f32 %v2310_v60, %v6077_v49 }
 0x337   : > { %v2405_v34 = vand.u32 4294901760, %v6080_v24 }
 0x338   : > { %v2395_v40 = vand.u32 4294901760, %v2394_v17 }
 0x339   : > { %v2406_v26 = vsub.f32 %v6080_v24, %v2405_v34 }
 0x33a   : > { %v2396_v63 = vsub.f32 %v2394_v17, %v2395_v40 }
 0x33b   : > { %v2407_v61 = vand.u32 4294901760, %v2406_v26 }
 0x33c   : > { %v2397_v58 = vand.u32 4294901760, %v2396_v63 }
 0x33e   : > { %4156 = vmatprep.mubr.f32.mxu1 %v2397_v58 }
 0x33f   : > { %4157 = vmatmul.mubr.f32.vlgmr.msra.gmra.mrb[2].mxu1 %v2407_v61 }
 0x340   : > { %4945 = vmatpush3.bf16.msra.mxu1 %v5667_v1  ;;  %4191 = vmatprep.mubr.f32.mxu1 %v6077_v49 }
 0x341   : > { %4947 = vmatprep.subr.bf16.mxu1 %v5706_v29 }
 0x344   : > { %4949 = vmatpush3.bf16.msra.mxu1 %v5706_v29 }
 0x345   : > { %4951 = vmatprep.subr.bf16.mxu1 %v5720_v41 }
 0x348   : > { %4953 = vmatpush3.bf16.msra.mxu1 %v5720_v41 }
 0x349   : > { %4955 = vmatprep.subr.bf16.mxu1 %v5732_v30 }
 0x34c   : > { %4957 = vmatpush3.bf16.msra.mxu1 %v5732_v30 }
 0x34d   : > { %4959 = vmatprep.subr.bf16.mxu1 %v5738_v15 }
 0x350   : > { %4961 = vmatpush3.bf16.msra.mxu1 %v5738_v15 }
 0x351   : > { %4963 = vmatprep.subr.bf16.mxu1 %v5745_v62 }
 0x354   : > { %4965 = vmatpush3.bf16.msra.mxu1 %v5745_v62 }
 0x355   : > { %4967 = vmatprep.subr.bf16.mxu1 %v5754_v8 }
 0x358   : > { %4969 = vmatpush3.bf16.msra.mxu1 %v5754_v8 }
 0x359   : > { %4971 = vmatprep.subr.bf16.mxu1 %v5760_v42 }
 0x35c   : > { %4973 = vmatpush3.bf16.msra.mxu1 %v5760_v42 }
 0x35d   : > { %4975 = vmatprep.subr.bf16.mxu1 %v5768_v18 }
 0x35f   : > { %4192 = vmatmul.mubr.f32.vlgmr.msra.gmra.mrb[2].mxu1 %v6075_v12 }
 0x360   : > { %4977 = vmatpush3.bf16.msra.mxu1 %v5768_v18  ;;  %4226 = vmatprep.mubr.f32.mxu1 %v2394_v17 }
 0x361   : > { %4979 = vmatprep.subr.bf16.mxu1 %v5779_v5 }
 0x364   : > { %4981 = vmatpush3.bf16.msra.mxu1 %v5779_v5 }
 0x365   : > { %4983 = vmatprep.subr.bf16.mxu1 %v5788_v56 }
 0x368   : > { %4985 = vmatpush3.bf16.msra.mxu1 %v5788_v56 }
 0x369   : > { %4987 = vmatprep.subr.bf16.mxu1 %v5797_v47 }
 0x36c   : > { %4989 = vmatpush3.bf16.msra.mxu1 %v5797_v47 }
 0x36d   : > { %4991 = vmatprep.subr.bf16.mxu1 %v5805_v48 }
 0x370   : > { %4993 = vmatpush3.bf16.msra.mxu1 %v5805_v48 }
 0x371   : > { %4995 = vmatprep.subr.bf16.mxu1 %v5813_v50 }
 0x374   : > { %4997 = vmatpush3.bf16.msra.mxu1 %v5813_v50 }
 0x375   : > { %4999 = vmatprep.subr.bf16.mxu1 %v5821_v52 }
 0x378   : > { %5001 = vmatpush3.bf16.msra.mxu1 %v5821_v52 }
 0x379   : > { %5003 = vmatprep.subr.bf16.mxu1 %v5829_v38 }
 0x37c   : > { %5005 = vmatpush3.bf16.msra.mxu1 %v5829_v38 }
 0x37d   : > { %5007 = vmatprep.subr.bf16.mxu1 %v6256_v46 }
 0x37f   : > { %4227 = vmatmul.mubr.f32.vlgmr.msra.gmra.mrb[2].mxu1 %v6080_v24 }
 0x380   : > { %5009 = vmatpush3.bf16.msra.mxu1 %v6256_v46  ;;  %4261 = vmatprep.mubr.f32.mxu1 %v2395_v40 }
 0x381   : > { %5011 = vmatprep.subr.bf16.mxu1 %v6257_v43 }
 0x384   : > { %5013 = vmatpush3.bf16.msra.mxu1 %v6257_v43 }
 0x385   : > { %5015 = vmatprep.subr.bf16.mxu1 %v6259_v22 }
 0x388   : > { %5017 = vmatpush3.bf16.msra.mxu1 %v6259_v22 }
 0x389   : > { %5019 = vmatprep.subr.bf16.mxu1 %v6260_v13 }
 0x38c   : > { %5021 = vmatpush3.bf16.msra.mxu1 %v6260_v13 }
 0x38d   : > { %5023 = vmatprep.subr.bf16.mxu1 %v6261_v16 }
 0x390   : > { %5025 = vmatpush3.bf16.msra.mxu1 %v6261_v16 }
 0x391   : > { %5027 = vmatprep.subr.bf16.mxu1 %v6262_v25 }
 0x394   : > { %5029 = vmatpush3.bf16.msra.mxu1 %v6262_v25 }
 0x395   : > { %5031 = vmatprep.subr.bf16.mxu1 %v5621_v54 }
 0x398   : > { %5033 = vmatpush3.bf16.msra.mxu1 %v5621_v54 }
 0x399   : > { %5035 = vmatprep.subr.bf16.mxu1 %v5625_v19 }
 0x39c   : > { %5037 = vmatpush3.bf16.msra.mxu1 %v5625_v19 }
 0x39d   : > { %5039 = vmatprep.subr.bf16.mxu1 %v6263_v33 }
 0x39f   : > { %4262 = vmatmul.mubr.f32.vlgmr.msra.gmra.mrb[2].mxu1 %v2405_v34 }
 0x3a0   : > { %5041 = vmatpush3.bf16.msra.mxu1 %v6263_v33  ;;  %4296 = vmatprep.mubr.f32.mxu1 %v6077_v49 }
 0x3a1   : > { %5043 = vmatprep.subr.bf16.mxu1 %v6265_v59 }
 0x3a4   : > { %5045 = vmatpush3.bf16.msra.mxu1 %v6265_v59 }
 0x3a5   : > { %5047 = vmatprep.subr.bf16.mxu1 %v5698_v21 }
 0x3a8   : > { %5049 = vmatpush3.bf16.msra.mxu1 %v5698_v21 }
 0x3a9   : > { %5051 = vmatprep.subr.bf16.mxu1 %v5700_v32 }
 0x3ac   : > { %5053 = vmatpush3.bf16.msra.mxu1 %v5700_v32 }
 0x3ad   : > { %5055 = vmatprep.subr.bf16.mxu1 %v5702_v14 }
 0x3b0   : > { %5057 = vmatpush3.bf16.msra.mxu1 %v5702_v14 }
 0x3b1   : > { %5059 = vmatprep.subr.bf16.mxu1 %v5708_v7 }
 0x3b4   : > { %5061 = vmatpush3.bf16.msra.mxu1 %v5708_v7 }
 0x3b5   : > { %5063 = vmatprep.subr.bf16.mxu1 %v5713_v2 }
 0x3b8   : > { %5065 = vmatpush3.bf16.msra.mxu1 %v5713_v2 }
 0x3b9   : > { %5067 = vmatprep.subr.bf16.mxu1 %v5715_v39 }
 0x3bc   : > { %5069 = vmatpush3.bf16.msra.mxu1 %v5715_v39 }
 0x3bd   : > { %5071 = vmatprep.subr.bf16.mxu1 %v6256_v46 }
 0x3bf   : > { %4297 = vmatmul.mubr.f32.vlgmr.msra.gmra.mrb[2].mxu1 %v6075_v12 }
 0x3c0   : > { %5073 = vmatpush3.bf16.msra.mxu1 %v6256_v46  ;;  %4331 = vmatprep.mubr.f32.mxu1 %v6077_v49 }
 0x3c1   : > { %5075 = vmatprep.subr.bf16.mxu1 %v6257_v43 }
 0x3c4   : > { %5077 = vmatpush3.bf16.msra.mxu1 %v6257_v43 }
 0x3c5   : > { %5079 = vmatprep.subr.bf16.mxu1 %v6259_v22 }
 0x3c8   : > { %5081 = vmatpush3.bf16.msra.mxu1 %v6259_v22 }
 0x3c9   : > { %5083 = vmatprep.subr.bf16.mxu1 %v6260_v13 }
 0x3cc   : > { %5085 = vmatpush3.bf16.msra.mxu1 %v6260_v13 }
 0x3cd   : > { %5087 = vmatprep.subr.bf16.mxu1 %v6261_v16 }
 0x3d0   : > { %5089 = vmatpush3.bf16.msra.mxu1 %v6261_v16 }
 0x3d1   : > { %5091 = vmatprep.subr.bf16.mxu1 %v6262_v25 }
 0x3d4   : > { %5093 = vmatpush3.bf16.msra.mxu1 %v6262_v25 }
 0x3d5   : > { %5095 = vmatprep.subr.bf16.mxu1 %v5621_v54 }
 0x3d8   : > { %5097 = vmatpush3.bf16.msra.mxu1 %v5621_v54 }
 0x3d9   : > { %5099 = vmatprep.subr.bf16.mxu1 %v5625_v19 }
 0x3dc   : > { %5101 = vmatpush3.bf16.msra.mxu1 %v5625_v19 }
 0x3df   : > { %4332 = vmatmul.mubr.f32.vlgmr.msra.gmra.mrb[2].mxu1 %v6075_v12 }
 0x4b2   : > { %v4333_v1 = vpop.f32.mrb[2].mxu1 }
 0x4b3   : > { %v2986_v29 = vpop.f32.mrb[3].mxu1 }
 0x4b4   : > { %v2996_v7 = vadd.f32 %v4333_v1, %v2986_v29 }
 0x4b6   : > { %v2997_v21 = vrot.slane %v2996_v7, 4 }
 0x4b8   : > { %v2998_v32 = vadd.f32 %v2997_v21, %v2996_v7 }
 0x4ba   : > { %v2999_v14 = vrot.slane %v2998_v32, 2 }
 0x4bc   : > { %v3000_v2 = vadd.f32 %v2999_v14, %v2998_v32 }
 0x4be   : > { %v3001_v39 = vrot.slane %v3000_v2, 1 }
 0x4c0   : > { %v3002_v41 = vadd.f32 %v3001_v39, %v3000_v2 }
 0x4c2   : > { %v3003_v54 = vmul.f32 0.0625, %v3002_v41 }
 0x4c4   : > { %3004 = vst [vmem:[%s166_s8] sm:$0x1] %v3003_v54 }
 0x4c5 PF: > { %s13_s12 = sadd.s32 1, %s5162_s12  }
 0x4c6   : > { %p10_p4 = scmp.ge.s32.totalorder %s13_s12, 4  }
 0x4c8   :  { %12 = sbr.rel (!%p10_p4) target bundleno = 1 (0x1), region = 62 }

</bundles_post_ra>
